<compile_context>
chip_gen: v7x
topology: tpu7x:2x2x1
jax: 0.10.0
libtpu: 0.0.40
codegen_flags: <defaults>
</compile_context>

<pallas_src>
import functools

import jax
import jax.numpy as jnp
from jax.experimental import pallas as pl
from jax.experimental.pallas import tpu as pltpu


# ---------------------------------------------------------------------------
# helpers
# ---------------------------------------------------------------------------
def _round_up(n, m):
    return ((n + m - 1) // m) * m


@functools.lru_cache(maxsize=None)
def _vmem_limit():
    """Per-generation VMEM budget: ~half of physical, clamped to [32, 96] MiB."""
    try:
        cap = int(pltpu.get_tpu_info().vmem_capacity_bytes)
    except Exception:  # conservative fallback if the query is unavailable
        cap = 64 * 1024 * 1024
    return int(min(max(cap // 2, 32 * 1024 * 1024), 96 * 1024 * 1024))


def _plan_lanes(n, max_blk=16384, min_blocks=2):
    """Lane tiling: blocks are multiples of 128, big (amortize ~0.35us/step),
    but split into >= min_blocks parallel steps so both v7x TCs get work."""
    npad = _round_up(n, 128)
    n128 = npad // 128
    blk = min(npad, max_blk)
    if min_blocks > 1 and n128 >= min_blocks:
        blk = min(blk, ((n128 + min_blocks - 1) // min_blocks) * 128)
    npad = _round_up(npad, blk)
    return blk, npad // blk, npad


# ---------------------------------------------------------------------------
# Pallas kernels
# ---------------------------------------------------------------------------
def _conv1x1_kernel(x_ref, w_ref, b_ref, o_ref, *, act):
    """o = act(W @ x + b).  W: (Cout, Cin) bf16, x: (Cin, blk), b: (Cout, 1) f32."""
    x = x_ref[...].astype(jnp.bfloat16)
    y = jnp.dot(w_ref[...], x, preferred_element_type=jnp.float32) + b_ref[...]
    if act == "lrelu":
        y = jnp.where(y >= 0.0, y, 0.1 * y)
    o_ref[...] = y.astype(o_ref.dtype)


def _conv3x3_kernel(x_ref, w_ref, b_ref, o_ref, *, W, act):
    """Valid 3x3 conv on a flattened canvas block (channel-major, lane-dense).

    x_ref: (Cp, N) canvas (one batch canvas, or several + lane pad),
    w_ref: (Cp, 9*Cp) bf16, column t*Cp + ci <- w[co, ci, ky, kx], t = ky*3+kx,
    b_ref: (Cp, 1) f32,  o_ref: (Cp, N).

    The 9 taps are lane rotations of the same resident canvas (XLU slot), kept
    in f32 so the sublane concat stays tile-aligned (Cp % 8 == 0), then cast
    once to bf16 and contracted with a single MXU dot.  Only output columns
    with y < H-2 and x < W-2 inside each batch canvas are valid; the remaining
    columns hold finite junk (wrap / cross-batch taps) and are never read.
    """
    N = x_ref.shape[-1]
    x = x_ref[...].astype(jnp.float32)
    taps = []
    for t in range(9):
        ky, kx = divmod(t, 3)
        s = ky * W + kx                                   # tap offset, < N
        taps.append(pltpu.roll(x, N - s, axis=1) if s else x)
    xcat = jnp.concatenate(taps, axis=0).astype(jnp.bfloat16)   # (9*Cp, N)
    y = jnp.dot(w_ref[...], xcat, preferred_element_type=jnp.float32) + b_ref[...]
    if act == "lrelu":
        y = jnp.where(y >= 0.0, y, 0.1 * y)
    o_ref[...] = y.astype(o_ref.dtype)


def _wiener_kernel(kr_ref, ki_ref, pr_ref, pi_ref, xr_ref, xi_ref,
                   or_ref, oi_ref):
    """CLS / Wiener deconv: out = conj(Fk) * Fx / (|Fk|^2 + |Fp|^2)."""
    kr, ki = kr_ref[0, 0], ki_ref[0, 0]          # (Hp, Wr), shared over channels
    pr, pi = pr_ref[0], pi_ref[0]                # (C, Hp, Wr)
    xr, xi = xr_ref[0], xi_ref[0]
    denom = kr * kr + ki * ki + pr * pr + pi * pi
    inv = 1.0 / denom                            # exact divide (matches torch)
    or_ref[0] = (kr * xr + ki * xi) * inv
    oi_ref[0] = (kr * xi - ki * xr) * inv


# ---------------------------------------------------------------------------
# Pallas wrappers
# ---------------------------------------------------------------------------
def conv1x1(x_cm, w_mat, b_col, act=None, out_dtype=jnp.float32, max_lanes=16384):
    """1x1 conv, channel-major, batch folded into lanes: (Cin, L) -> (Cout, Lpad).

    Returns the lane-padded result; callers slice back to L exactly once, where
    spatial structure is needed again (review: no per-call slice passes).
    """
    Cin, L = x_cm.shape
    Cout = w_mat.shape[0]
    blk, nblk, Lpad = _plan_lanes(L, max_lanes)
    if Lpad != L:
        x_cm = jnp.pad(x_cm, ((0, 0), (0, Lpad - L)))
    return pl.pallas_call(
        functools.partial(_conv1x1_kernel, act=act),
        out_shape=jax.ShapeDtypeStruct((Cout, Lpad), out_dtype),
        grid=(nblk,),
        in_specs=[
            pl.BlockSpec((Cin, blk), lambda j: (0, j)),
            pl.BlockSpec((Cout, Cin), lambda j: (0, 0)),
            pl.BlockSpec((Cout, 1), lambda j: (0, 0)),
        ],
        out_specs=pl.BlockSpec((Cout, blk), lambda j: (0, j)),
        compiler_params=pltpu.CompilerParams(
            dimension_semantics=("parallel",),
            vmem_limit_bytes=_vmem_limit()),
    )(x_cm, w_mat, b_col)


def conv3x3_valid_canvas(x_cm, w_cat, b_col, B, H, W, act=None,
                         out_dtype=jnp.float32):
    """Valid 3x3 conv over B flattened HxW canvases stored as (Cp, >= B*H*W)."""
    Cin, Lin = x_cm.shape
    Cout = w_cat.shape[0]
    HW = H * W
    if HW % 128 == 0 and Lin >= B * HW:
        # one canvas per grid step -> B parallel steps (keeps both v7x TCs busy)
        grid, blk, Lout = (B,), HW, B * HW
        idx = lambda b: (0, b)
    else:
        # TODO(synk): band-tile rows with a 2-row halo for very large canvases
        # (v7x 64 MiB VMEM); the full-canvas block is fine at these sizes.
        grid, blk, Lout = (1,), Lin, Lin
        idx = lambda b: (0, 0)
    return pl.pallas_call(
        functools.partial(_conv3x3_kernel, W=W, act=act),
        out_shape=jax.ShapeDtypeStruct((Cout, Lout), out_dtype),
        grid=grid,
        in_specs=[
            pl.BlockSpec((Cin, blk), idx),
            pl.BlockSpec(w_cat.shape, lambda b: (0, 0)),
            pl.BlockSpec((Cout, 1), lambda b: (0, 0)),
        ],
        out_specs=pl.BlockSpec((Cout, blk), idx),
        compiler_params=pltpu.CompilerParams(
            dimension_semantics=("parallel",),
            vmem_limit_bytes=_vmem_limit()),
    )(x_cm, w_cat, b_col)


def wiener_deconv(Fk, Fp, Fx):
    """out = conj(Fk) / (|Fk|^2 + |Fp|^2) * Fx, element-wise on half-spectra.

    Fk: (B, 1, Hp, Wr) complex64 (shared over channels -- its block is reused,
    never broadcast in HBM); Fp, Fx: (B, C, Hp, Wr) complex64.
    Returns (real, imag) planes of shape (B, C, Hp, Wr) f32.  No flatten, pad
    or slice passes around the kernel (review item).
    """
    B, C, Hp, Wr = Fx.shape
    kr, ki = jnp.real(Fk), jnp.imag(Fk)
    pr, pi = jnp.real(Fp), jnp.imag(Fp)
    xr, xi = jnp.real(Fx), jnp.imag(Fx)

    k_spec = pl.BlockSpec((1, 1, Hp, Wr), lambda b: (b, 0, 0, 0))
    c_spec = pl.BlockSpec((1, C, Hp, Wr), lambda b: (b, 0, 0, 0))
    plane = jax.ShapeDtypeStruct((B, C, Hp, Wr), jnp.float32)
    return pl.pallas_call(
        _wiener_kernel,
        out_shape=(plane, plane),
        grid=(B,),
        in_specs=[k_spec, k_spec, c_spec, c_spec, c_spec, c_spec],
        out_specs=(c_spec, c_spec),
        compiler_params=pltpu.CompilerParams(
            dimension_semantics=("parallel",),
            vmem_limit_bytes=_vmem_limit()),
    )(kr, ki, pr, pi, xr, xi)


# ---------------------------------------------------------------------------
# JAX glue (tiny tail ops, psf2otf, FFT)
# ---------------------------------------------------------------------------
def adaptive_avg_pool_nchw(x, out_h, out_w):
    """Exact nn.AdaptiveAvgPool2d bin semantics (tiny tensor -> plain jnp)."""
    B, C, H, W = x.shape
    rows = []
    for i in range(out_h):
        h0 = (i * H) // out_h
        h1 = -((-(i + 1) * H) // out_h)
        cols = []
        for j in range(out_w):
            w0 = (j * W) // out_w
            w1 = -((-(j + 1) * W) // out_w)
            cols.append(jnp.mean(x[:, :, h0:h1, w0:w1], axis=(2, 3)))
        rows.append(jnp.stack(cols, axis=-1))
    return jnp.stack(rows, axis=-2)  # (B, C, out_h, out_w)


def psf2otf_r(psf, Hp, Wp):
    """convert_psf2otf: zero-pad to (Hp, Wp), circular shift by -(k//2), rfft2."""
    B, C, k, _ = psf.shape
    big = jnp.zeros((B, C, Hp, Wp), dtype=psf.dtype)
    big = big.at[:, :, :k, :k].set(psf)
    big = jnp.roll(big, shift=(-(k // 2), -(k // 2)), axis=(-2, -1))
    return jnp.fft.rfft2(big)


# ---------------------------------------------------------------------------
# CLS forward
# ---------------------------------------------------------------------------
def cls_forward(x, kernel, params):
    """x: (B, nf, H, W) f32, kernel: (B, 1, ks, ks) f32, params: prepare_params()."""
    B, nf, H, W = x.shape
    ks = kernel.shape[-1]
    C = params["w_g4"].shape[0]              # true channel count (nf // reduction)
    HW = H * W
    L = B * HW

    # channel-major layout with batch folded into the lane axis: (nf, B*H*W)
    x_cm = jnp.transpose(x, (1, 0, 2, 3)).reshape(nf, L)

    # reduce_feature (1x1).  Output rows padded to Cp (zero weights/bias) so the
    # 3x3 tap concat stays tile-aligned; f32 because it also feeds the FFT path.
    cls_cm = conv1x1(x_cm, params["w_reduce"], params["b_reduce"],
                     out_dtype=jnp.float32)

    # grad_filter: three chained valid 3x3 convs on a fixed canvas (valid window
    # shrinks by 2 per conv; junk columns are never read).  bf16 intermediates
    # halve the HBM traffic between the convs.
    g = conv3x3_valid_canvas(cls_cm, params["w_g1"], params["b_g1"], B, H, W,
                             act="lrelu", out_dtype=jnp.bfloat16)
    g = conv3x3_valid_canvas(g, params["w_g2"], params["b_g2"], B, H, W,
                             act="lrelu", out_dtype=jnp.bfloat16)
    g = conv3x3_valid_canvas(g, params["w_g3"], params["b_g3"], B, H, W,
                             act=None, out_dtype=jnp.float32)

    # tiny tail (B*C*9 elements after pooling): plain jnp on purpose -- a
    # pallas_call here costs more than the compute.
    g_bchw = jnp.transpose(g[:C, :L].reshape(C, B, H, W), (1, 0, 2, 3))
    g_valid = g_bchw[:, :, :H - 6, :W - 6]
    gp = adaptive_avg_pool_nchw(g_valid, 3, 3)
    gk = jnp.einsum("oc,bcij->boij", params["w_g4"], gp) \
        + params["b_g4"].reshape(1, C, 1, 1)
    kP = jnp.exp(gk)
    kernel_P = kP - jnp.mean(kP, axis=(2, 3), keepdims=True)      # (B, C, 3, 3)

    # Wiener/CLS deconvolution in the Fourier domain (replicate-pad by ks).
    cls_bchw = jnp.transpose(cls_cm[:C, :L].reshape(C, B, H, W), (1, 0, 2, 3))
    feat_pad = jnp.pad(cls_bchw, ((0, 0), (0, 0), (ks, ks), (ks, ks)),
                       mode="edge")
    Hp, Wp = H + 2 * ks, W + 2 * ks

    Fk = psf2otf_r(kernel.astype(jnp.float32), Hp, Wp)            # (B, 1, Hp, Wr)
    Fp = psf2otf_r(kernel_P, Hp, Wp)                              # (B, C, Hp, Wr)
    Fx = jnp.fft.rfft2(feat_pad)                                  # (B, C, Hp, Wr)

    dr, di = wiener_deconv(Fk, Fp, Fx)
    deblur = jnp.fft.irfft2(jax.lax.complex(dr, di), s=(Hp, Wp))  # (B, C, Hp, Wp)
    clear = deblur[:, :, ks:-ks, ks:-ks]                          # (B, C, H, W)

    # expand_feature (1x1), then back to NCHW (single final slice of lane pad).
    clear_cm = jnp.transpose(clear, (1, 0, 2, 3)).reshape(C, L)
    out_cm = conv1x1(clear_cm, params["w_expand"], params["b_expand"],
                     out_dtype=jnp.float32)
    out = jnp.transpose(out_cm[:, :L].reshape(nf, B, H, W), (1, 0, 2, 3))
    return out


# ---------------------------------------------------------------------------
# Parameters: torch Conv2d layout (Cout, Cin, kh, kw) -> prepared ONCE into the
# kernels' channel-major layouts (pre-transposed, channel-padded, bf16).
# ---------------------------------------------------------------------------
def init_params(key, nf=16, reduction=4):
    c = nf // reduction
    keys = jax.random.split(key, 12)

    def rnd(k, shape, scale=0.1):
        return scale * jax.random.normal(k, shape, dtype=jnp.float32)

    return {
        "w_reduce": rnd(keys[0], (c, nf, 1, 1)),
        "b_reduce": rnd(keys[1], (c,), 0.01),
        "w_g1": rnd(keys[2], (c, c, 3, 3)),
        "b_g1": rnd(keys[3], (c,), 0.01),
        "w_g2": rnd(keys[4], (c, c, 3, 3)),
        "b_g2": rnd(keys[5], (c,), 0.01),
        "w_g3": rnd(keys[6], (c, c, 3, 3)),
        "b_g3": rnd(keys[7], (c,), 0.01),
        "w_g4": rnd(keys[8], (c, c, 1, 1)),
        "b_g4": rnd(keys[9], (c,), 0.01),
        "w_expand": rnd(keys[10], (nf, c, 1, 1)),
        "b_expand": rnd(keys[11], (nf,), 0.01),
    }


def prepare_params(p):
    """One-time layout prep.

    * 1x1 weights -> (Cout, Cin) bf16; biases -> (Cout, 1) f32.
    * 3x3 weights -> (Cp, 9*Cp) bf16 with Cp = round_up(C, 8), column layout
      t*Cp + ci (t = ky*3 + kx) matching the in-kernel rolled-tap concat.
      Channel pad rows/cols are zero, so padded activation rows stay zero.
    * reduce conv emits Cp rows (zero pad rows) so the whole grad-filter chain
      runs on the padded channel count with tile-aligned sublane concats.
    """
    C, nf = p["w_reduce"].shape[:2]
    Cp = _round_up(C, 8)

    def bias_col(b, rows):
        return jnp.pad(b, (0, rows - b.shape[0])).reshape(-1, 1).astype(jnp.float32)

    prep = {
        "w_reduce": jnp.pad(p["w_reduce"][:, :, 0, 0],
                            ((0, Cp - C), (0, 0))).astype(jnp.bfloat16),
        "b_reduce": bias_col(p["b_reduce"], Cp),
        "w_expand": p["w_expand"][:, :, 0, 0].astype(jnp.bfloat16),
        "b_expand": bias_col(p["b_expand"], nf),
        "w_g4": p["w_g4"][:, :, 0, 0].astype(jnp.float32),
        "b_g4": p["b_g4"].astype(jnp.float32),
    }
    for name in ("g1", "g2", "g3"):
        w = p[f"w_{name}"]                                     # (C, C, 3, 3)
        wt = jnp.transpose(w, (2, 3, 0, 1)).reshape(9, C, C)   # (t, co, ci)
        wt = jnp.pad(wt, ((0, 0), (0, Cp - C), (0, Cp - C)))   # (9, Cp, Cp)
        prep[f"w_{name}"] = (jnp.transpose(wt, (1, 0, 2))
                             .reshape(Cp, 9 * Cp).astype(jnp.bfloat16))
        prep[f"b_{name}"] = bias_col(p[f"b_{name}"], Cp)
    return prep


if __name__ == "__main__":
    key = jax.random.PRNGKey(0)
    k_x, k_k, k_p = jax.random.split(key, 3)

    B, nf, H, W = 2, 16, 16, 16
    reduction = 4
    ks = 5

    x = jax.random.normal(k_x, (B, nf, H, W), dtype=jnp.float32)
    raw_k = jax.random.normal(k_k, (B, 1, ks * ks), dtype=jnp.float32)
    # normalized, positive blur kernel (like a softmax-ed estimated PSF)
    kernel = jax.nn.softmax(raw_k, axis=-1).reshape(B, 1, ks, ks)

    params = prepare_params(init_params(k_p, nf=nf, reduction=reduction))

    out = jax.jit(cls_forward)(x, kernel, params)
    out = jax.block_until_ready(out)

    assert out.shape == (B, nf, H, W), out.shape
    assert bool(jnp.all(jnp.isfinite(out)))
    print("KERNEL_OK")
</pallas_src>

<mosaic_0001>
module attributes {stable_mosaic.version = 11 : i64} {
  func.func @_conv1x1_kernel(%arg0: i32, %arg1: memref<16x256xf32, #tpu.memory_space<vmem>>, %arg2: memref<8x16xbf16, #tpu.memory_space<vmem>>, %arg3: memref<8x1xf32, #tpu.memory_space<vmem>>, %arg4: memref<8x256xf32, #tpu.memory_space<vmem>>) attributes {dimension_semantics = [#tpu.dimension_semantics<parallel>], iteration_bounds = array<i64: 2>, scalar_prefetch = 0 : i64, scratch_operands = 0 : i64, tpu.core_type = #tpu.core_type<tc>, window_params = [{transform_indices = @transform_0, window_bounds = array<i64: 16, 256>}, {pipeline_mode = #tpu.pipeline_mode<synchronous>, transform_indices = @transform_1, window_bounds = array<i64: 8, 16>}, {pipeline_mode = #tpu.pipeline_mode<synchronous>, transform_indices = @transform_2, window_bounds = array<i64: 8, 1>}, {transform_indices = @transform_3, window_bounds = array<i64: 8, 256>}]} {
    %c0 = arith.constant 0 : index
    %c0_0 = arith.constant 0 : index
    %0 = vector.load %arg1[%c0, %c0_0] : memref<16x256xf32, #tpu.memory_space<vmem>>, vector<16x256xf32>
    %1 = arith.truncf %0 : vector<16x256xf32> to vector<16x256xbf16>
    %c0_1 = arith.constant 0 : index
    %c0_2 = arith.constant 0 : index
    %2 = vector.load %arg2[%c0_1, %c0_2] : memref<8x16xbf16, #tpu.memory_space<vmem>>, vector<8x16xbf16>
    %cst = arith.constant dense<0.000000e+00> : vector<8x256xf32>
    %3 = tpu.matmul %2, %1, %cst {dimension_numbers = #tpu.dot_dimension_numbers<[1], [0], [0], [1], [0, 0, 1, 1], [], []>} : vector<8x16xbf16>, vector<16x256xbf16>, vector<8x256xf32> -> vector<8x256xf32>
    %c0_3 = arith.constant 0 : index
    %c0_4 = arith.constant 0 : index
    %4 = vector.load %arg3[%c0_3, %c0_4] : memref<8x1xf32, #tpu.memory_space<vmem>>, vector<8x1xf32>
    %5 = vector.broadcast %4 : vector<8x1xf32> to vector<8x256xf32>
    %6 = arith.addf %3, %5 : vector<8x256xf32>
    %c0_5 = arith.constant 0 : index
    %c0_6 = arith.constant 0 : index
    %7 = vector.load %arg4[%c0_5, %c0_6] : memref<8x256xf32, #tpu.memory_space<vmem>>, vector<8x256xf32>
    tpu.vector_store %arg4[%c0_5, %c0_6], %6 {strides = array<i32>} : memref<8x256xf32, #tpu.memory_space<vmem>>, vector<8x256xf32>,
    return
  }
  func.func @transform_0(%arg0: i32) -> (i32, i32) {
    %c0_i32 = arith.constant 0 : i32
    %c0_i32_0 = arith.constant 0 : i32
    return %c0_i32, %arg0 : i32, i32
  }
  func.func @transform_1(%arg0: i32) -> (i32, i32) {
    %c0_i32 = arith.constant 0 : i32
    %c0_i32_0 = arith.constant 0 : i32
    %c0_i32_1 = arith.constant 0 : i32
    return %c0_i32, %c0_i32_0 : i32, i32
  }
  func.func @transform_2(%arg0: i32) -> (i32, i32) {
    %c0_i32 = arith.constant 0 : i32
    %c0_i32_0 = arith.constant 0 : i32
    %c0_i32_1 = arith.constant 0 : i32
    return %c0_i32, %c0_i32_0 : i32, i32
  }
  func.func @transform_3(%arg0: i32) -> (i32, i32) {
    %c0_i32 = arith.constant 0 : i32
    %c0_i32_0 = arith.constant 0 : i32
    return %c0_i32, %arg0 : i32, i32
  }
}

module attributes {stable_mosaic.version = 11 : i64} {
  func.func @_conv3x3_kernel(%arg0: i32, %arg1: memref<8x256xf32, #tpu.memory_space<vmem>>, %arg2: memref<8x72xbf16, #tpu.memory_space<vmem>>, %arg3: memref<8x1xf32, #tpu.memory_space<vmem>>, %arg4: memref<8x256xbf16, #tpu.memory_space<vmem>>) attributes {dimension_semantics = [#tpu.dimension_semantics<parallel>], iteration_bounds = array<i64: 2>, scalar_prefetch = 0 : i64, scratch_operands = 0 : i64, tpu.core_type = #tpu.core_type<tc>, window_params = [{transform_indices = @transform_0, window_bounds = array<i64: 8, 256>}, {pipeline_mode = #tpu.pipeline_mode<synchronous>, transform_indices = @transform_1, window_bounds = array<i64: 8, 72>}, {pipeline_mode = #tpu.pipeline_mode<synchronous>, transform_indices = @transform_2, window_bounds = array<i64: 8, 1>}, {transform_indices = @transform_3, window_bounds = array<i64: 8, 256>}]} {
    %c0 = arith.constant 0 : index
    %c0_0 = arith.constant 0 : index
    %0 = vector.load %arg1[%c0, %c0_0] : memref<8x256xf32, #tpu.memory_space<vmem>>, vector<8x256xf32>
    %c255_i32 = arith.constant 255 : i32
    %1 = tpu.dynamic_rotate %0 by %c255_i32 dim 1 : vector<8x256xf32>, i32 -> vector<8x256xf32>
    %c254_i32 = arith.constant 254 : i32
    %2 = tpu.dynamic_rotate %0 by %c254_i32 dim 1 : vector<8x256xf32>, i32 -> vector<8x256xf32>
    %c240_i32 = arith.constant 240 : i32
    %3 = tpu.dynamic_rotate %0 by %c240_i32 dim 1 : vector<8x256xf32>, i32 -> vector<8x256xf32>
    %c239_i32 = arith.constant 239 : i32
    %4 = tpu.dynamic_rotate %0 by %c239_i32 dim 1 : vector<8x256xf32>, i32 -> vector<8x256xf32>
    %c238_i32 = arith.constant 238 : i32
    %5 = tpu.dynamic_rotate %0 by %c238_i32 dim 1 : vector<8x256xf32>, i32 -> vector<8x256xf32>
    %c224_i32 = arith.constant 224 : i32
    %6 = tpu.dynamic_rotate %0 by %c224_i32 dim 1 : vector<8x256xf32>, i32 -> vector<8x256xf32>
    %c223_i32 = arith.constant 223 : i32
    %7 = tpu.dynamic_rotate %0 by %c223_i32 dim 1 : vector<8x256xf32>, i32 -> vector<8x256xf32>
    %c222_i32 = arith.constant 222 : i32
    %8 = tpu.dynamic_rotate %0 by %c222_i32 dim 1 : vector<8x256xf32>, i32 -> vector<8x256xf32>
    %9 = tpu.concatenate %0, %1, %2, %3, %4, %5, %6, %7, %8 in 0 : vector<8x256xf32>, vector<8x256xf32>, vector<8x256xf32>, vector<8x256xf32>, vector<8x256xf32>, vector<8x256xf32>, vector<8x256xf32>, vector<8x256xf32>, vector<8x256xf32> -> vector<72x256xf32>
    %10 = arith.truncf %9 : vector<72x256xf32> to vector<72x256xbf16>
    %c0_1 = arith.constant 0 : index
    %c0_2 = arith.constant 0 : index
    %11 = vector.load %arg2[%c0_1, %c0_2] : memref<8x72xbf16, #tpu.memory_space<vmem>>, vector<8x72xbf16>
    %cst = arith.constant dense<0.000000e+00> : vector<8x256xf32>
    %12 = tpu.matmul %11, %10, %cst {dimension_numbers = #tpu.dot_dimension_numbers<[1], [0], [0], [1], [0, 0, 1, 1], [], []>} : vector<8x72xbf16>, vector<72x256xbf16>, vector<8x256xf32> -> vector<8x256xf32>
    %c0_3 = arith.constant 0 : index
    %c0_4 = arith.constant 0 : index
    %13 = vector.load %arg3[%c0_3, %c0_4] : memref<8x1xf32, #tpu.memory_space<vmem>>, vector<8x1xf32>
    %14 = vector.broadcast %13 : vector<8x1xf32> to vector<8x256xf32>
    %15 = arith.addf %12, %14 : vector<8x256xf32>
    %cst_5 = arith.constant 0.000000e+00 : f32
    %16 = vector.broadcast %cst_5 : f32 to vector<8x256xf32>
    %17 = arith.cmpf oge, %15, %16 : vector<8x256xf32>
    %cst_6 = arith.constant 1.000000e-01 : f32
    %18 = vector.broadcast %cst_6 : f32 to vector<8x256xf32>
    %19 = arith.mulf %18, %15 : vector<8x256xf32>
    %20 = arith.select %17, %15, %19 : vector<8x256xi1>, vector<8x256xf32>
    %21 = arith.truncf %20 : vector<8x256xf32> to vector<8x256xbf16>
    %c0_7 = arith.constant 0 : index
    %c0_8 = arith.constant 0 : index
    %22 = vector.load %arg4[%c0_7, %c0_8] : memref<8x256xbf16, #tpu.memory_space<vmem>>, vector<8x256xbf16>
    tpu.vector_store %arg4[%c0_7, %c0_8], %21 {strides = array<i32>} : memref<8x256xbf16, #tpu.memory_space<vmem>>, vector<8x256xbf16>,
    return
  }
  func.func @transform_0(%arg0: i32) -> (i32, i32) {
    %c0_i32 = arith.constant 0 : i32
    %c0_i32_0 = arith.constant 0 : i32
    return %c0_i32, %arg0 : i32, i32
  }
  func.func @transform_1(%arg0: i32) -> (i32, i32) {
    %c0_i32 = arith.constant 0 : i32
    %c0_i32_0 = arith.constant 0 : i32
    %c0_i32_1 = arith.constant 0 : i32
    return %c0_i32, %c0_i32_0 : i32, i32
  }
  func.func @transform_2(%arg0: i32) -> (i32, i32) {
    %c0_i32 = arith.constant 0 : i32
    %c0_i32_0 = arith.constant 0 : i32
    %c0_i32_1 = arith.constant 0 : i32
    return %c0_i32, %c0_i32_0 : i32, i32
  }
  func.func @transform_3(%arg0: i32) -> (i32, i32) {
    %c0_i32 = arith.constant 0 : i32
    %c0_i32_0 = arith.constant 0 : i32
    return %c0_i32, %arg0 : i32, i32
  }
}

module attributes {stable_mosaic.version = 11 : i64} {
  func.func @_conv3x3_kernel(%arg0: i32, %arg1: memref<8x256xbf16, #tpu.memory_space<vmem>>, %arg2: memref<8x72xbf16, #tpu.memory_space<vmem>>, %arg3: memref<8x1xf32, #tpu.memory_space<vmem>>, %arg4: memref<8x256xbf16, #tpu.memory_space<vmem>>) attributes {dimension_semantics = [#tpu.dimension_semantics<parallel>], iteration_bounds = array<i64: 2>, scalar_prefetch = 0 : i64, scratch_operands = 0 : i64, tpu.core_type = #tpu.core_type<tc>, window_params = [{transform_indices = @transform_0, window_bounds = array<i64: 8, 256>}, {pipeline_mode = #tpu.pipeline_mode<synchronous>, transform_indices = @transform_1, window_bounds = array<i64: 8, 72>}, {pipeline_mode = #tpu.pipeline_mode<synchronous>, transform_indices = @transform_2, window_bounds = array<i64: 8, 1>}, {transform_indices = @transform_3, window_bounds = array<i64: 8, 256>}]} {
    %c0 = arith.constant 0 : index
    %c0_0 = arith.constant 0 : index
    %0 = vector.load %arg1[%c0, %c0_0] : memref<8x256xbf16, #tpu.memory_space<vmem>>, vector<8x256xbf16>
    %1 = arith.extf %0 : vector<8x256xbf16> to vector<8x256xf32>
    %c255_i32 = arith.constant 255 : i32
    %2 = tpu.dynamic_rotate %1 by %c255_i32 dim 1 : vector<8x256xf32>, i32 -> vector<8x256xf32>
    %c254_i32 = arith.constant 254 : i32
    %3 = tpu.dynamic_rotate %1 by %c254_i32 dim 1 : vector<8x256xf32>, i32 -> vector<8x256xf32>
    %c240_i32 = arith.constant 240 : i32
    %4 = tpu.dynamic_rotate %1 by %c240_i32 dim 1 : vector<8x256xf32>, i32 -> vector<8x256xf32>
    %c239_i32 = arith.constant 239 : i32
    %5 = tpu.dynamic_rotate %1 by %c239_i32 dim 1 : vector<8x256xf32>, i32 -> vector<8x256xf32>
    %c238_i32 = arith.constant 238 : i32
    %6 = tpu.dynamic_rotate %1 by %c238_i32 dim 1 : vector<8x256xf32>, i32 -> vector<8x256xf32>
    %c224_i32 = arith.constant 224 : i32
    %7 = tpu.dynamic_rotate %1 by %c224_i32 dim 1 : vector<8x256xf32>, i32 -> vector<8x256xf32>
    %c223_i32 = arith.constant 223 : i32
    %8 = tpu.dynamic_rotate %1 by %c223_i32 dim 1 : vector<8x256xf32>, i32 -> vector<8x256xf32>
    %c222_i32 = arith.constant 222 : i32
    %9 = tpu.dynamic_rotate %1 by %c222_i32 dim 1 : vector<8x256xf32>, i32 -> vector<8x256xf32>
    %10 = tpu.concatenate %1, %2, %3, %4, %5, %6, %7, %8, %9 in 0 : vector<8x256xf32>, vector<8x256xf32>, vector<8x256xf32>, vector<8x256xf32>, vector<8x256xf32>, vector<8x256xf32>, vector<8x256xf32>, vector<8x256xf32>, vector<8x256xf32> -> vector<72x256xf32>
    %11 = arith.truncf %10 : vector<72x256xf32> to vector<72x256xbf16>
    %c0_1 = arith.constant 0 : index
    %c0_2 = arith.constant 0 : index
    %12 = vector.load %arg2[%c0_1, %c0_2] : memref<8x72xbf16, #tpu.memory_space<vmem>>, vector<8x72xbf16>
    %cst = arith.constant dense<0.000000e+00> : vector<8x256xf32>
    %13 = tpu.matmul %12, %11, %cst {dimension_numbers = #tpu.dot_dimension_numbers<[1], [0], [0], [1], [0, 0, 1, 1], [], []>} : vector<8x72xbf16>, vector<72x256xbf16>, vector<8x256xf32> -> vector<8x256xf32>
    %c0_3 = arith.constant 0 : index
    %c0_4 = arith.constant 0 : index
    %14 = vector.load %arg3[%c0_3, %c0_4] : memref<8x1xf32, #tpu.memory_space<vmem>>, vector<8x1xf32>
    %15 = vector.broadcast %14 : vector<8x1xf32> to vector<8x256xf32>
    %16 = arith.addf %13, %15 : vector<8x256xf32>
    %cst_5 = arith.constant 0.000000e+00 : f32
    %17 = vector.broadcast %cst_5 : f32 to vector<8x256xf32>
    %18 = arith.cmpf oge, %16, %17 : vector<8x256xf32>
    %cst_6 = arith.constant 1.000000e-01 : f32
    %19 = vector.broadcast %cst_6 : f32 to vector<8x256xf32>
    %20 = arith.mulf %19, %16 : vector<8x256xf32>
    %21 = arith.select %18, %16, %20 : vector<8x256xi1>, vector<8x256xf32>
    %22 = arith.truncf %21 : vector<8x256xf32> to vector<8x256xbf16>
    %c0_7 = arith.constant 0 : index
    %c0_8 = arith.constant 0 : index
    %23 = vector.load %arg4[%c0_7, %c0_8] : memref<8x256xbf16, #tpu.memory_space<vmem>>, vector<8x256xbf16>
    tpu.vector_store %arg4[%c0_7, %c0_8], %22 {strides = array<i32>} : memref<8x256xbf16, #tpu.memory_space<vmem>>, vector<8x256xbf16>,
    return
  }
  func.func @transform_0(%arg0: i32) -> (i32, i32) {
    %c0_i32 = arith.constant 0 : i32
    %c0_i32_0 = arith.constant 0 : i32
    return %c0_i32, %arg0 : i32, i32
  }
  func.func @transform_1(%arg0: i32) -> (i32, i32) {
    %c0_i32 = arith.constant 0 : i32
    %c0_i32_0 = arith.constant 0 : i32
    %c0_i32_1 = arith.constant 0 : i32
    return %c0_i32, %c0_i32_0 : i32, i32
  }
  func.func @transform_2(%arg0: i32) -> (i32, i32) {
    %c0_i32 = arith.constant 0 : i32
    %c0_i32_0 = arith.constant 0 : i32
    %c0_i32_1 = arith.constant 0 : i32
    return %c0_i32, %c0_i32_0 : i32, i32
  }
  func.func @transform_3(%arg0: i32) -> (i32, i32) {
    %c0_i32 = arith.constant 0 : i32
    %c0_i32_0 = arith.constant 0 : i32
    return %c0_i32, %arg0 : i32, i32
  }
}

module attributes {stable_mosaic.version = 11 : i64} {
  func.func @_conv3x3_kernel(%arg0: i32, %arg1: memref<8x256xbf16, #tpu.memory_space<vmem>>, %arg2: memref<8x72xbf16, #tpu.memory_space<vmem>>, %arg3: memref<8x1xf32, #tpu.memory_space<vmem>>, %arg4: memref<8x256xf32, #tpu.memory_space<vmem>>) attributes {dimension_semantics = [#tpu.dimension_semantics<parallel>], iteration_bounds = array<i64: 2>, scalar_prefetch = 0 : i64, scratch_operands = 0 : i64, tpu.core_type = #tpu.core_type<tc>, window_params = [{transform_indices = @transform_0, window_bounds = array<i64: 8, 256>}, {pipeline_mode = #tpu.pipeline_mode<synchronous>, transform_indices = @transform_1, window_bounds = array<i64: 8, 72>}, {pipeline_mode = #tpu.pipeline_mode<synchronous>, transform_indices = @transform_2, window_bounds = array<i64: 8, 1>}, {transform_indices = @transform_3, window_bounds = array<i64: 8, 256>}]} {
    %c0 = arith.constant 0 : index
    %c0_0 = arith.constant 0 : index
    %0 = vector.load %arg1[%c0, %c0_0] : memref<8x256xbf16, #tpu.memory_space<vmem>>, vector<8x256xbf16>
    %1 = arith.extf %0 : vector<8x256xbf16> to vector<8x256xf32>
    %c255_i32 = arith.constant 255 : i32
    %2 = tpu.dynamic_rotate %1 by %c255_i32 dim 1 : vector<8x256xf32>, i32 -> vector<8x256xf32>
    %c254_i32 = arith.constant 254 : i32
    %3 = tpu.dynamic_rotate %1 by %c254_i32 dim 1 : vector<8x256xf32>, i32 -> vector<8x256xf32>
    %c240_i32 = arith.constant 240 : i32
    %4 = tpu.dynamic_rotate %1 by %c240_i32 dim 1 : vector<8x256xf32>, i32 -> vector<8x256xf32>
    %c239_i32 = arith.constant 239 : i32
    %5 = tpu.dynamic_rotate %1 by %c239_i32 dim 1 : vector<8x256xf32>, i32 -> vector<8x256xf32>
    %c238_i32 = arith.constant 238 : i32
    %6 = tpu.dynamic_rotate %1 by %c238_i32 dim 1 : vector<8x256xf32>, i32 -> vector<8x256xf32>
    %c224_i32 = arith.constant 224 : i32
    %7 = tpu.dynamic_rotate %1 by %c224_i32 dim 1 : vector<8x256xf32>, i32 -> vector<8x256xf32>
    %c223_i32 = arith.constant 223 : i32
    %8 = tpu.dynamic_rotate %1 by %c223_i32 dim 1 : vector<8x256xf32>, i32 -> vector<8x256xf32>
    %c222_i32 = arith.constant 222 : i32
    %9 = tpu.dynamic_rotate %1 by %c222_i32 dim 1 : vector<8x256xf32>, i32 -> vector<8x256xf32>
    %10 = tpu.concatenate %1, %2, %3, %4, %5, %6, %7, %8, %9 in 0 : vector<8x256xf32>, vector<8x256xf32>, vector<8x256xf32>, vector<8x256xf32>, vector<8x256xf32>, vector<8x256xf32>, vector<8x256xf32>, vector<8x256xf32>, vector<8x256xf32> -> vector<72x256xf32>
    %11 = arith.truncf %10 : vector<72x256xf32> to vector<72x256xbf16>
    %c0_1 = arith.constant 0 : index
    %c0_2 = arith.constant 0 : index
    %12 = vector.load %arg2[%c0_1, %c0_2] : memref<8x72xbf16, #tpu.memory_space<vmem>>, vector<8x72xbf16>
    %cst = arith.constant dense<0.000000e+00> : vector<8x256xf32>
    %13 = tpu.matmul %12, %11, %cst {dimension_numbers = #tpu.dot_dimension_numbers<[1], [0], [0], [1], [0, 0, 1, 1], [], []>} : vector<8x72xbf16>, vector<72x256xbf16>, vector<8x256xf32> -> vector<8x256xf32>
    %c0_3 = arith.constant 0 : index
    %c0_4 = arith.constant 0 : index
    %14 = vector.load %arg3[%c0_3, %c0_4] : memref<8x1xf32, #tpu.memory_space<vmem>>, vector<8x1xf32>
    %15 = vector.broadcast %14 : vector<8x1xf32> to vector<8x256xf32>
    %16 = arith.addf %13, %15 : vector<8x256xf32>
    %c0_5 = arith.constant 0 : index
    %c0_6 = arith.constant 0 : index
    %17 = vector.load %arg4[%c0_5, %c0_6] : memref<8x256xf32, #tpu.memory_space<vmem>>, vector<8x256xf32>
    tpu.vector_store %arg4[%c0_5, %c0_6], %16 {strides = array<i32>} : memref<8x256xf32, #tpu.memory_space<vmem>>, vector<8x256xf32>,
    return
  }
  func.func @transform_0(%arg0: i32) -> (i32, i32) {
    %c0_i32 = arith.constant 0 : i32
    %c0_i32_0 = arith.constant 0 : i32
    return %c0_i32, %arg0 : i32, i32
  }
  func.func @transform_1(%arg0: i32) -> (i32, i32) {
    %c0_i32 = arith.constant 0 : i32
    %c0_i32_0 = arith.constant 0 : i32
    %c0_i32_1 = arith.constant 0 : i32
    return %c0_i32, %c0_i32_0 : i32, i32
  }
  func.func @transform_2(%arg0: i32) -> (i32, i32) {
    %c0_i32 = arith.constant 0 : i32
    %c0_i32_0 = arith.constant 0 : i32
    %c0_i32_1 = arith.constant 0 : i32
    return %c0_i32, %c0_i32_0 : i32, i32
  }
  func.func @transform_3(%arg0: i32) -> (i32, i32) {
    %c0_i32 = arith.constant 0 : i32
    %c0_i32_0 = arith.constant 0 : i32
    return %c0_i32, %arg0 : i32, i32
  }
}

module attributes {stable_mosaic.version = 11 : i64} {
  func.func @_wiener_kernel(%arg0: i32, %arg1: memref<1x1x26x14xf32, #tpu.memory_space<vmem>>, %arg2: memref<1x1x26x14xf32, #tpu.memory_space<vmem>>, %arg3: memref<1x4x26x14xf32, #tpu.memory_space<vmem>>, %arg4: memref<1x4x26x14xf32, #tpu.memory_space<vmem>>, %arg5: memref<1x4x26x14xf32, #tpu.memory_space<vmem>>, %arg6: memref<1x4x26x14xf32, #tpu.memory_space<vmem>>, %arg7: memref<1x4x26x14xf32, #tpu.memory_space<vmem>>, %arg8: memref<1x4x26x14xf32, #tpu.memory_space<vmem>>) attributes {dimension_semantics = [#tpu.dimension_semantics<parallel>], iteration_bounds = array<i64: 2>, scalar_prefetch = 0 : i64, scratch_operands = 0 : i64, tpu.core_type = #tpu.core_type<tc>, window_params = [{transform_indices = @transform_0, window_bounds = array<i64: 1, 1, 26, 14>}, {transform_indices = @transform_1, window_bounds = array<i64: 1, 1, 26, 14>}, {transform_indices = @transform_2, window_bounds = array<i64: 1, 4, 26, 14>}, {transform_indices = @transform_3, window_bounds = array<i64: 1, 4, 26, 14>}, {transform_indices = @transform_4, window_bounds = array<i64: 1, 4, 26, 14>}, {transform_indices = @transform_5, window_bounds = array<i64: 1, 4, 26, 14>}, {transform_indices = @transform_6, window_bounds = array<i64: 1, 4, 26, 14>}, {transform_indices = @transform_7, window_bounds = array<i64: 1, 4, 26, 14>}]} {
    %c0 = arith.constant 0 : index
    %c0_0 = arith.constant 0 : index
    %c0_1 = arith.constant 0 : index
    %c0_2 = arith.constant 0 : index
    %0 = vector.load %arg1[%c0, %c0_0, %c0_1, %c0_2] : memref<1x1x26x14xf32, #tpu.memory_space<vmem>>, vector<1x1x26x14xf32>
    %1 = vector.shape_cast %0 : vector<1x1x26x14xf32> to vector<26x14xf32>
    %c0_3 = arith.constant 0 : index
    %c0_4 = arith.constant 0 : index
    %c0_5 = arith.constant 0 : index
    %c0_6 = arith.constant 0 : index
    %2 = vector.load %arg2[%c0_3, %c0_4, %c0_5, %c0_6] : memref<1x1x26x14xf32, #tpu.memory_space<vmem>>, vector<1x1x26x14xf32>
    %3 = vector.shape_cast %2 : vector<1x1x26x14xf32> to vector<26x14xf32>
    %c0_7 = arith.constant 0 : index
    %c0_8 = arith.constant 0 : index
    %c0_9 = arith.constant 0 : index
    %c0_10 = arith.constant 0 : index
    %4 = vector.load %arg3[%c0_7, %c0_8, %c0_9, %c0_10] : memref<1x4x26x14xf32, #tpu.memory_space<vmem>>, vector<1x4x26x14xf32>
    %5 = vector.shape_cast %4 : vector<1x4x26x14xf32> to vector<4x26x14xf32>
    %c0_11 = arith.constant 0 : index
    %c0_12 = arith.constant 0 : index
    %c0_13 = arith.constant 0 : index
    %c0_14 = arith.constant 0 : index
    %6 = vector.load %arg4[%c0_11, %c0_12, %c0_13, %c0_14] : memref<1x4x26x14xf32, #tpu.memory_space<vmem>>, vector<1x4x26x14xf32>
    %7 = vector.shape_cast %6 : vector<1x4x26x14xf32> to vector<4x26x14xf32>
    %c0_15 = arith.constant 0 : index
    %c0_16 = arith.constant 0 : index
    %c0_17 = arith.constant 0 : index
    %c0_18 = arith.constant 0 : index
    %8 = vector.load %arg5[%c0_15, %c0_16, %c0_17, %c0_18] : memref<1x4x26x14xf32, #tpu.memory_space<vmem>>, vector<1x4x26x14xf32>
    %9 = vector.shape_cast %8 : vector<1x4x26x14xf32> to vector<4x26x14xf32>
    %c0_19 = arith.constant 0 : index
    %c0_20 = arith.constant 0 : index
    %c0_21 = arith.constant 0 : index
    %c0_22 = arith.constant 0 : index
    %10 = vector.load %arg6[%c0_19, %c0_20, %c0_21, %c0_22] : memref<1x4x26x14xf32, #tpu.memory_space<vmem>>, vector<1x4x26x14xf32>
    %11 = vector.shape_cast %10 : vector<1x4x26x14xf32> to vector<4x26x14xf32>
    %12 = arith.mulf %1, %1 : vector<26x14xf32>
    %13 = arith.mulf %3, %3 : vector<26x14xf32>
    %14 = arith.addf %12, %13 : vector<26x14xf32>
    %15 = arith.mulf %5, %5 : vector<4x26x14xf32>
    %16 = vector.shape_cast %14 : vector<26x14xf32> to vector<1x26x14xf32>
    %17 = vector.broadcast %16 : vector<1x26x14xf32> to vector<4x26x14xf32>
    %18 = arith.addf %17, %15 : vector<4x26x14xf32>
    %19 = arith.mulf %7, %7 : vector<4x26x14xf32>
    %20 = arith.addf %18, %19 : vector<4x26x14xf32>
    %cst = arith.constant 1.000000e+00 : f32
    %21 = vector.broadcast %cst : f32 to vector<4x26x14xf32>
    %22 = arith.divf %21, %20 : vector<4x26x14xf32>
    %23 = vector.shape_cast %1 : vector<26x14xf32> to vector<1x26x14xf32>
    %24 = vector.broadcast %23 : vector<1x26x14xf32> to vector<4x26x14xf32>
    %25 = arith.mulf %24, %9 : vector<4x26x14xf32>
    %26 = vector.shape_cast %3 : vector<26x14xf32> to vector<1x26x14xf32>
    %27 = vector.broadcast %26 : vector<1x26x14xf32> to vector<4x26x14xf32>
    %28 = arith.mulf %27, %11 : vector<4x26x14xf32>
    %29 = arith.addf %25, %28 : vector<4x26x14xf32>
    %30 = arith.mulf %29, %22 : vector<4x26x14xf32>
    %c0_23 = arith.constant 0 : index
    %c0_24 = arith.constant 0 : index
    %c0_25 = arith.constant 0 : index
    %c0_26 = arith.constant 0 : index
    %31 = vector.load %arg7[%c0_23, %c0_24, %c0_25, %c0_26] : memref<1x4x26x14xf32, #tpu.memory_space<vmem>>, vector<1x4x26x14xf32>
    %32 = vector.shape_cast %31 : vector<1x4x26x14xf32> to vector<4x26x14xf32>
    %33 = vector.shape_cast %30 : vector<4x26x14xf32> to vector<1x4x26x14xf32>
    tpu.vector_store %arg7[%c0_23, %c0_24, %c0_25, %c0_26], %33 {strides = array<i32>} : memref<1x4x26x14xf32, #tpu.memory_space<vmem>>, vector<1x4x26x14xf32>,
    %34 = vector.shape_cast %1 : vector<26x14xf32> to vector<1x26x14xf32>
    %35 = vector.broadcast %34 : vector<1x26x14xf32> to vector<4x26x14xf32>
    %36 = arith.mulf %35, %11 : vector<4x26x14xf32>
    %37 = vector.shape_cast %3 : vector<26x14xf32> to vector<1x26x14xf32>
    %38 = vector.broadcast %37 : vector<1x26x14xf32> to vector<4x26x14xf32>
    %39 = arith.mulf %38, %9 : vector<4x26x14xf32>
    %40 = arith.subf %36, %39 : vector<4x26x14xf32>
    %41 = arith.mulf %40, %22 : vector<4x26x14xf32>
    %c0_27 = arith.constant 0 : index
    %c0_28 = arith.constant 0 : index
    %c0_29 = arith.constant 0 : index
    %c0_30 = arith.constant 0 : index
    %42 = vector.load %arg8[%c0_27, %c0_28, %c0_29, %c0_30] : memref<1x4x26x14xf32, #tpu.memory_space<vmem>>, vector<1x4x26x14xf32>
    %43 = vector.shape_cast %42 : vector<1x4x26x14xf32> to vector<4x26x14xf32>
    %44 = vector.shape_cast %41 : vector<4x26x14xf32> to vector<1x4x26x14xf32>
    tpu.vector_store %arg8[%c0_27, %c0_28, %c0_29, %c0_30], %44 {strides = array<i32>} : memref<1x4x26x14xf32, #tpu.memory_space<vmem>>, vector<1x4x26x14xf32>,
    return
  }
  func.func @transform_0(%arg0: i32) -> (i32, i32, i32, i32) {
    %c0_i32 = arith.constant 0 : i32
    %c0_i32_0 = arith.constant 0 : i32
    %c0_i32_1 = arith.constant 0 : i32
    %c0_i32_2 = arith.constant 0 : i32
    return %arg0, %c0_i32, %c0_i32_0, %c0_i32_1 : i32, i32, i32, i32
  }
  func.func @transform_1(%arg0: i32) -> (i32, i32, i32, i32) {
    %c0_i32 = arith.constant 0 : i32
    %c0_i32_0 = arith.constant 0 : i32
    %c0_i32_1 = arith.constant 0 : i32
    %c0_i32_2 = arith.constant 0 : i32
    return %arg0, %c0_i32, %c0_i32_0, %c0_i32_1 : i32, i32, i32, i32
  }
  func.func @transform_2(%arg0: i32) -> (i32, i32, i32, i32) {
    %c0_i32 = arith.constant 0 : i32
    %c0_i32_0 = arith.constant 0 : i32
    %c0_i32_1 = arith.constant 0 : i32
    %c0_i32_2 = arith.constant 0 : i32
    return %arg0, %c0_i32, %c0_i32_0, %c0_i32_1 : i32, i32, i32, i32
  }
  func.func @transform_3(%arg0: i32) -> (i32, i32, i32, i32) {
    %c0_i32 = arith.constant 0 : i32
    %c0_i32_0 = arith.constant 0 : i32
    %c0_i32_1 = arith.constant 0 : i32
    %c0_i32_2 = arith.constant 0 : i32
    return %arg0, %c0_i32, %c0_i32_0, %c0_i32_1 : i32, i32, i32, i32
  }
  func.func @transform_4(%arg0: i32) -> (i32, i32, i32, i32) {
    %c0_i32 = arith.constant 0 : i32
    %c0_i32_0 = arith.constant 0 : i32
    %c0_i32_1 = arith.constant 0 : i32
    %c0_i32_2 = arith.constant 0 : i32
    return %arg0, %c0_i32, %c0_i32_0, %c0_i32_1 : i32, i32, i32, i32
  }
  func.func @transform_5(%arg0: i32) -> (i32, i32, i32, i32) {
    %c0_i32 = arith.constant 0 : i32
    %c0_i32_0 = arith.constant 0 : i32
    %c0_i32_1 = arith.constant 0 : i32
    %c0_i32_2 = arith.constant 0 : i32
    return %arg0, %c0_i32, %c0_i32_0, %c0_i32_1 : i32, i32, i32, i32
  }
  func.func @transform_6(%arg0: i32) -> (i32, i32, i32, i32) {
    %c0_i32 = arith.constant 0 : i32
    %c0_i32_0 = arith.constant 0 : i32
    %c0_i32_1 = arith.constant 0 : i32
    %c0_i32_2 = arith.constant 0 : i32
    return %arg0, %c0_i32, %c0_i32_0, %c0_i32_1 : i32, i32, i32, i32
  }
  func.func @transform_7(%arg0: i32) -> (i32, i32, i32, i32) {
    %c0_i32 = arith.constant 0 : i32
    %c0_i32_0 = arith.constant 0 : i32
    %c0_i32_1 = arith.constant 0 : i32
    %c0_i32_2 = arith.constant 0 : i32
    return %arg0, %c0_i32, %c0_i32_0, %c0_i32_1 : i32, i32, i32, i32
  }
}

module attributes {stable_mosaic.version = 11 : i64} {
  func.func @_conv1x1_kernel(%arg0: i32, %arg1: memref<4x256xf32, #tpu.memory_space<vmem>>, %arg2: memref<16x4xbf16, #tpu.memory_space<vmem>>, %arg3: memref<16x1xf32, #tpu.memory_space<vmem>>, %arg4: memref<16x256xf32, #tpu.memory_space<vmem>>) attributes {dimension_semantics = [#tpu.dimension_semantics<parallel>], iteration_bounds = array<i64: 2>, scalar_prefetch = 0 : i64, scratch_operands = 0 : i64, tpu.core_type = #tpu.core_type<tc>, window_params = [{transform_indices = @transform_0, window_bounds = array<i64: 4, 256>}, {pipeline_mode = #tpu.pipeline_mode<synchronous>, transform_indices = @transform_1, window_bounds = array<i64: 16, 4>}, {pipeline_mode = #tpu.pipeline_mode<synchronous>, transform_indices = @transform_2, window_bounds = array<i64: 16, 1>}, {transform_indices = @transform_3, window_bounds = array<i64: 16, 256>}]} {
    %c0 = arith.constant 0 : index
    %c0_0 = arith.constant 0 : index
    %0 = vector.load %arg1[%c0, %c0_0] : memref<4x256xf32, #tpu.memory_space<vmem>>, vector<4x256xf32>
    %1 = arith.truncf %0 : vector<4x256xf32> to vector<4x256xbf16>
    %c0_1 = arith.constant 0 : index
    %c0_2 = arith.constant 0 : index
    %2 = vector.load %arg2[%c0_1, %c0_2] : memref<16x4xbf16, #tpu.memory_space<vmem>>, vector<16x4xbf16>
    %cst = arith.constant dense<0.000000e+00> : vector<16x256xf32>
    %3 = tpu.matmul %2, %1, %cst {dimension_numbers = #tpu.dot_dimension_numbers<[1], [0], [0], [1], [0, 0, 1, 1], [], []>} : vector<16x4xbf16>, vector<4x256xbf16>, vector<16x256xf32> -> vector<16x256xf32>
    %c0_3 = arith.constant 0 : index
    %c0_4 = arith.constant 0 : index
    %4 = vector.load %arg3[%c0_3, %c0_4] : memref<16x1xf32, #tpu.memory_space<vmem>>, vector<16x1xf32>
    %5 = vector.broadcast %4 : vector<16x1xf32> to vector<16x256xf32>
    %6 = arith.addf %3, %5 : vector<16x256xf32>
    %c0_5 = arith.constant 0 : index
    %c0_6 = arith.constant 0 : index
    %7 = vector.load %arg4[%c0_5, %c0_6] : memref<16x256xf32, #tpu.memory_space<vmem>>, vector<16x256xf32>
    tpu.vector_store %arg4[%c0_5, %c0_6], %6 {strides = array<i32>} : memref<16x256xf32, #tpu.memory_space<vmem>>, vector<16x256xf32>,
    return
  }
  func.func @transform_0(%arg0: i32) -> (i32, i32) {
    %c0_i32 = arith.constant 0 : i32
    %c0_i32_0 = arith.constant 0 : i32
    return %c0_i32, %arg0 : i32, i32
  }
  func.func @transform_1(%arg0: i32) -> (i32, i32) {
    %c0_i32 = arith.constant 0 : i32
    %c0_i32_0 = arith.constant 0 : i32
    %c0_i32_1 = arith.constant 0 : i32
    return %c0_i32, %c0_i32_0 : i32, i32
  }
  func.func @transform_2(%arg0: i32) -> (i32, i32) {
    %c0_i32 = arith.constant 0 : i32
    %c0_i32_0 = arith.constant 0 : i32
    %c0_i32_1 = arith.constant 0 : i32
    return %c0_i32, %c0_i32_0 : i32, i32
  }
  func.func @transform_3(%arg0: i32) -> (i32, i32) {
    %c0_i32 = arith.constant 0 : i32
    %c0_i32_0 = arith.constant 0 : i32
    return %c0_i32, %arg0 : i32, i32
  }
}

</mosaic_0001>

<bundles_post_ra>
// kernel: cls_forward.6
= control target key start
LH: loop header
LB: loop body
LE: loop exit
PB: predicated region body
PF: predicated region fallthrough
CT: control target
= control target key end

     0   :  { %s408_s12 = smov 0   ;;  %s410_s13 = smov 0   ;;  %s466_s0 = inlined_call_operand.vmem [shape: f32[16,512], index: 0, kind: input, shape index: {}]   ;;  %s467_s1 = inlined_call_operand.vmem [shape: bf16[8,16], index: 1, kind: input, shape index: {}]   ;;  %s468_s2 = inlined_call_operand.vmem [shape: f32[8,1], index: 2, kind: input, shape index: {}]   ;;  %s469_s3 = inlined_call_operand.vmem [shape: f32[8,512], index: 3, kind: output, shape index: {}]  }
   0x1   :  { %s412_s14 = smov 0  }
   0x2 LB: > { %s322_s15 = sadd.s32 4294967295, %s385_s14   ;;  %s425_s16 = sadd.s32 1, %s385_s14   ;;  %s385_s14 = sphi %s412_s14, %s472_s14   ;;  %s381_s13 = sphi %s410_s13, %s471_s13   ;;  %s377_s12 = sphi %s408_s12, %s470_s12  }
   0x3   : > { %s17_s17 = ssub.s32 %s385_s14, %s425_s16  ;;  %s20_s18 = sadd.s32 1, %s381_s13 }
   0x4   : > { %p18_p0 = scmp.eq.s32.totalorder %s17_s17, 0  ;;  %p27_p1 = scmp.ne.s32.totalorder %s381_s13, %s377_s12 }
   0x5   : > { %p28_p2 = scmp.eq.s32.totalorder %s385_s14, 0  ;;  %p325_p4 = scmp.ge.s32.totalorder %s385_s14, 2 }
   0x6   : > { %s434_s19 = scalar_select %p18_p0, %s381_s13, %s20_s18  }
   0x7   : > { %p29_p3 = por %p28_p2, %p27_p1  ;;  %127 = sbr.rel (%p325_p4) target bundleno = 21 (0x15), region = 24 }
   0xe   : > { %130 = sbr.rel (!%p29_p3) target bundleno = 21 (0x15), region = 28  ;;  %s132_s20 = sand.u32 (%p29_p3), 1, %s381_s13  }
   0xf   : > { %s336_s21 = sshll.u32 (%p29_p3), %s385_s14, 4  ;;  %s326_s22 = sshll.u32 (%p29_p3), %s132_s20, 5 }
  0x10   : > { %s137_s25 = scalar_lea.vmem (%p29_p3), %s466_s0, %s336_s21  ;;  %s134_s26 = scalar_lea.vmem (%p29_p3), [#allocation2], %s326_s22 }
  0x11   : > { %v150_v0 = vld [vmem:[%s137_s25] sm:$0xff] (%p29_p3)  ;;  %v152_v1 = vld [vmem:[%s137_s25 + $0x8] sm:$0xff] (%p29_p3) }
  0x12   : > { %v154_v2 = vld [vmem:[%s137_s25 + $0x20] sm:$0xff] (%p29_p3)  ;;  %151 = vst [vmem:[%s134_s26] sm:$0xff] (%p29_p3), %v150_v0  ;;  %153 = vst [vmem:[%s134_s26 + $0x8] sm:$0xff] (%p29_p3), %v152_v1  ;;  %v156_v3 = vld [vmem:[%s137_s25 + $0x28] sm:$0xff] (%p29_p3) }
  0x13   : > { %155 = vst [vmem:[%s134_s26 + $0x10] sm:$0xff] (%p29_p3), %v154_v2  ;;  %157 = vst [vmem:[%s134_s26 + $0x18] sm:$0xff] (%p29_p3), %v156_v3 }
  0x15 PF: > { %p329_p5 = scmp.ge.s32.totalorder %s385_s14, 1  ;;  %p162_p6 = scmp.lt.s32.totalorder %s385_s14, 3 }
  0x17   : > { %p163_p7 = pnand %p329_p5, %p162_p6 }
  0x18   : > { %s169_s27 = sand.u32 (!%p163_p7), 1, %s377_s12   ;;  %v207_v4 = vld [vmem:[%s468_s2] sm:$0xff] (!%p163_p7)  ;;  %v387_v5 = vmov (!%p163_p7), 0   ;;  %vm213_vm0 = vcmask (!%p163_p7), 130048   ;;  %s331_s7 = sshll.u32 (!%p163_p7), %s322_s15, 1 }
  0x19   : > { %166 = sbr.rel (%p163_p7) target bundleno = 250 (0xfa), region = 51  ;;  %s330_s30 = sshll.u32 (!%p163_p7), %s169_s27, 5  ;;  %249 = vmatprep.mubr.bf16.mxu0 (!%p163_p7), %v387_v5  ;;  %362 = vset.pattern.permute.xlu0 (!%p163_p7), %v387_v5  ;;  %v206_v12 = vld [vmem:[%s467_s1] sm:$0xf] (!%p163_p7) }
  0x1a   : > { %210 = vperm.xlu0 (!%p163_p7), %362, %v207_v4   ;;  %s171_s4 = scalar_lea.vmem (!%p163_p7), [#allocation2], %s330_s30  ;;  %p194_p8 = scmp.lt.s32.totalorder (!%p163_p7), %s331_s7, 3 }
  0x1b   : > { %v201_v6 = vld [vmem:[%s171_s4 + $0x8] sm:$0xff] (!%p163_p7)  ;;  %v203_v7 = vld [vmem:[%s171_s4 + $0x18] sm:$0xff] (!%p163_p7)  ;;  %v200_v8 = vld [vmem:[%s171_s4] sm:$0xff] (!%p163_p7) }
  0x1c   : > { %v205_v9 = vpack.c.bf16 (!%p163_p7), %v203_v7, %v201_v6  ;;  %v202_v10 = vld [vmem:[%s171_s4 + $0x10] sm:$0xff] (!%p163_p7) }
  0x1d   : > { %v204_v11 = vpack.c.bf16 (!%p163_p7), %v202_v10, %v200_v8 }
  0x1e   : > { %217 = vmatprep.subr.bf16.mxu0 (!%p163_p7), %v205_v9 }
  0x1f   : > { %218 = vmatpush1.bf16.msra.mxu0 (!%p163_p7), %v204_v11 }
  0x20   : > { %s474_s7 = smov (!%p194_p8, %s331_s7), 3 }
  0x21   : > { %s332_s8 = sshll.u32 %s474_s7, 3 }
  0x22   : > { %333 = vmatmul.mubr.msk.bf16.vlgmr.msra.gmra.mrb[0].mxu0 %vm213_vm0, %v206_v12  ;;  %s197_s11 = scalar_lea.vmem %s469_s3, %s332_s8 }
  0x99   : > { %v211_v13 = vpop.permute.xlu0 %210 }
  0xf5   : > { %v251_v14 = vpop.f32.mrb[0].mxu0 }
  0xf6   : > { %v252_v15 = vadd.f32 %v251_v14, %v211_v13  ;;  %v253_v16 = vpop.f32.mrb[1].mxu0 }
  0xf7   : > { %v254_v17 = vadd.f32 %v253_v16, %v211_v13  ;;  %v255_v18 = vpop.f32.mrb[2].mxu0 }
  0xf8   : > { %258 = vst [vmem:[%s197_s11] sm:$0xff] %v252_v15  ;;  %v256_v19 = vpop.f32.mrb[3].mxu0 }
  0xf9   : > { %259 = vst [vmem:[%s197_s11 + $0x8] sm:$0xff] %v254_v17 }
  0xfa PF: > { %p10_p9 = scmp.ge.s32.totalorder %s425_s16, 4   ;;  %s470_s12 = smov %s381_s13 }
  0xfb   : > { %s471_s13 = smov %s434_s19  ;;  %s472_s14 = smov %s425_s16 }
  0xfc   :  { %12 = sbr.rel (!%p10_p9) target bundleno = 2 (0x2), region = 90 }

// kernel: cls_forward.7
= control target key start
LH: loop header
LB: loop body
LE: loop exit
PB: predicated region body
PF: predicated region fallthrough
CT: control target
= control target key end

     0   :  { %s485_s12 = smov 0   ;;  %s518_s0 = inlined_call_operand.vmem [shape: f32[8,512], index: 0, kind: input, shape index: {}]   ;;  %s519_s1 = inlined_call_operand.vmem [shape: bf16[8,72], index: 1, kind: input, shape index: {}]   ;;  %s520_s2 = inlined_call_operand.vmem [shape: f32[8,1], index: 2, kind: input, shape index: {}]   ;;  %s521_s3 = inlined_call_operand.vmem [shape: bf16[8,512], index: 3, kind: output, shape index: {}]  }
   0x1 LB: > { %s375_s13 = sadd.s32 4294967295, %s454_s12   ;;  %p379_p0 = scmp.ge.s32.totalorder %s454_s12, 1  ;;  %s454_s12 = sphi %s485_s12, %s13_s12  }
   0x2   : > { %p138_p1 = scmp.lt.s32.totalorder %s454_s12, 3 }
   0x4   : > { %p139_p2 = pnand %p379_p0, %p138_p1 }
   0x5   : > { %s380_s14 = sshll.u32 (!%p139_p2), %s375_s13, 1  ;;  %s456_s19 = smov (!%p139_p2), 127   ;;  %v462_v3 = vmov (!%p139_p2), 0   ;;  %v246_v4 = vld [vmem:[%s520_s2] sm:$0xff] (!%p139_p2)  ;;  %v181_v5 = vlaneseq (!%p139_p2)  ;;  %vm256_vm8 = vcmask (!%p139_p2), 1043456   ;;  %vm252_vm9 = vcmask (!%p139_p2), 588800  }
   0x6   : > { %142 = sbr.rel (%p139_p2) target bundleno = 380 (0x17c), region = 32  ;;  %p163_p3 = scmp.lt.s32.totalorder (!%p139_p2), %s380_s14, 3  ;;  %295 = vmatprep.mubr.bf16.mxu0 (!%p139_p2), %v462_v3  ;;  %447 = vset.pattern.permute.xlu0 (!%p139_p2), %v462_v3  ;;  %v245_v58 = vld [vmem:[%s519_s1] sm:$0xf] (!%p139_p2) }
   0x7   : > { %s457_s20 = smov (!%p139_p2), 112   ;;  %s458_s21 = smov (!%p139_p2), 126   ;;  %v182_v6 = vand.u32 (!%p139_p2), 127, %v181_v5 }
   0x8   : > { %s459_s22 = smov (!%p139_p2), 111   ;;  %s460_s23 = smov (!%p139_p2), 110  }
   0x9   : > { %s461_s24 = smov (!%p139_p2), 96   ;;  %s463_s25 = smov (!%p139_p2), 95   ;;  %vm183_vm0 = vcmp.lt.s32.totalorder (!%p139_p2), %v182_v6, 127  ;;  %vm197_vm1 = vcmp.lt.s32.totalorder (!%p139_p2), %v182_v6, 112  ;;  %vm190_vm2 = vcmp.lt.s32.totalorder (!%p139_p2), %v182_v6, 126  ;;  %vm204_vm3 = vcmp.lt.s32.totalorder (!%p139_p2), %v182_v6, 111 }
   0xa   : > { %s464_s26 = smov (!%p139_p2), 94   ;;  %vm211_vm4 = vcmp.lt.s32.totalorder (!%p139_p2), %v182_v6, 110  ;;  %vm218_vm5 = vcmp.lt.s32.totalorder (!%p139_p2), %v182_v6, 96  ;;  %vm232_vm6 = vcmp.lt.s32.totalorder (!%p139_p2), %v182_v6, 94  ;;  %vm225_vm7 = vcmp.lt.s32.totalorder (!%p139_p2), %v182_v6, 95 }
   0xd   : > { %s523_s14 = smov (!%p163_p3, %s380_s14), 3 }
   0xe   : > { %s381_s15 = sshll.u32 %s523_s14, 3  ;;  %s383_s4 = sshll.u32 %s523_s14, 2 }
   0xf   : > { %s166_s18 = scalar_lea.vmem %s518_s0, %s381_s15  ;;  %s172_s7 = scalar_lea.vmem %s521_s3, %s383_s4 }
  0x10   : > { %v175_v0 = vld [vmem:[%s166_s18] sm:$0xff]  ;;  %v176_v1 = vld [vmem:[%s166_s18 + $0x8] sm:$0xff] }
  0x11   : > { %v407_v2 = vpack.i.bf16 %v176_v1, %v175_v0 }
  0x13   : > { %408 = vrot.lane.b32.xlu0 %v407_v2, %s456_s19  ;;  %418 = vrot.lane.b32.xlu1 %v407_v2, %s457_s20 }
  0x17   : > { %413 = vrot.lane.b32.xlu0 %v407_v2, %s458_s21  ;;  %423 = vrot.lane.b32.xlu1 %v407_v2, %s459_s22 }
  0x1b   : > { %428 = vrot.lane.b32.xlu0 %v407_v2, %s460_s23  ;;  %433 = vrot.lane.b32.xlu1 %v407_v2, %s461_s24 }
  0x1f   : > { %438 = vrot.lane.b32.xlu0 %v407_v2, %s463_s25  ;;  %443 = vrot.lane.b32.xlu1 %v407_v2, %s464_s26 }
  0x23   : > { %249 = vperm.xlu0 %447, %v246_v4  }
  0x85   : > { %v409_v7 = vpop.permute.xlu0 %408  ;;  %v419_v8 = vpop.permute.xlu1 %418 }
  0x86   : > { %v411_v9 = vunpack.i.h.bf16 %v409_v7  ;;  %v410_v10 = vunpack.i.l.bf16 %v409_v7  ;;  %v421_v11 = vunpack.i.h.bf16 %v419_v8  ;;  %v420_v12 = vunpack.i.l.bf16 %v419_v8 }
  0x88   : > { %v185_v13 = vsel %vm183_vm0, %v411_v9, %v410_v10  ;;  %v184_v14 = vsel %vm183_vm0, %v410_v10, %v411_v9  ;;  %v199_v19 = vsel %vm197_vm1, %v421_v11, %v420_v12  ;;  %v198_v20 = vsel %vm197_vm1, %v420_v12, %v421_v11 }
  0x89   : > { %v414_v15 = vpop.permute.xlu0 %413  ;;  %v236_v16 = vpack.c.bf16 %v185_v13, %v176_v1  ;;  %v235_v17 = vpack.c.bf16 %v184_v14, %v175_v0  ;;  %v424_v18 = vpop.permute.xlu1 %423 }
  0x8a   : > { %v416_v21 = vunpack.i.h.bf16 %v414_v15  ;;  %v415_v22 = vunpack.i.l.bf16 %v414_v15  ;;  %v426_v23 = vunpack.i.h.bf16 %v424_v18  ;;  %v425_v24 = vunpack.i.l.bf16 %v424_v18 }
  0x8b   : > { %263 = vmatprep.subr.bf16.mxu0 %v236_v16 }
  0x8c   : > { %264 = vmatpush1.bf16.msra.mxu0 %v235_v17  ;;  %v192_v25 = vsel %vm190_vm2, %v416_v21, %v415_v22  ;;  %v191_v26 = vsel %vm190_vm2, %v415_v22, %v416_v21  ;;  %v206_v31 = vsel %vm204_vm3, %v426_v23, %v425_v24  ;;  %v205_v32 = vsel %vm204_vm3, %v425_v24, %v426_v23 }
  0x8d   : > { %v429_v27 = vpop.permute.xlu0 %428  ;;  %v238_v28 = vpack.c.bf16 %v199_v19, %v192_v25  ;;  %v237_v29 = vpack.c.bf16 %v198_v20, %v191_v26  ;;  %v434_v30 = vpop.permute.xlu1 %433 }
  0x8e   : > { %v431_v33 = vunpack.i.h.bf16 %v429_v27  ;;  %v430_v34 = vunpack.i.l.bf16 %v429_v27  ;;  %v436_v35 = vunpack.i.h.bf16 %v434_v30  ;;  %v435_v36 = vunpack.i.l.bf16 %v434_v30 }
  0x8f   : > { %265 = vmatprep.subr.bf16.mxu0 %v238_v28 }
  0x90   : > { %266 = vmatpush1.bf16.msra.mxu0 %v237_v29  ;;  %v213_v37 = vsel %vm211_vm4, %v431_v33, %v430_v34  ;;  %v212_v38 = vsel %vm211_vm4, %v430_v34, %v431_v33  ;;  %v220_v43 = vsel %vm218_vm5, %v436_v35, %v435_v36  ;;  %v219_v44 = vsel %vm218_vm5, %v435_v36, %v436_v35 }
  0x91   : > { %v439_v39 = vpop.permute.xlu0 %438  ;;  %v240_v40 = vpack.c.bf16 %v213_v37, %v206_v31  ;;  %v239_v41 = vpack.c.bf16 %v212_v38, %v205_v32  ;;  %v444_v42 = vpop.permute.xlu1 %443 }
  0x92   : > { %v441_v45 = vunpack.i.h.bf16 %v439_v39  ;;  %v440_v46 = vunpack.i.l.bf16 %v439_v39  ;;  %v446_v47 = vunpack.i.h.bf16 %v444_v42  ;;  %v445_v48 = vunpack.i.l.bf16 %v444_v42 }
  0x93   : > { %267 = vmatprep.subr.bf16.mxu0 %v240_v40 }
  0x94   : > { %268 = vmatpush1.bf16.msra.mxu0 %v239_v41  ;;  %v234_v49 = vsel %vm232_vm6, %v446_v47, %v445_v48  ;;  %v227_v50 = vsel %vm225_vm7, %v441_v45, %v440_v46  ;;  %v226_v51 = vsel %vm225_vm7, %v440_v46, %v441_v45  ;;  %v233_v52 = vsel %vm232_vm6, %v445_v48, %v446_v47 }
  0x95   : > { %v244_v53 = vpack.c.bf16 %v234_v49, %v234_v49  ;;  %v242_v54 = vpack.c.bf16 %v227_v50, %v220_v43  ;;  %v241_v55 = vpack.c.bf16 %v226_v51, %v219_v44  ;;  %v243_v56 = vpack.c.bf16 %v233_v52, %v233_v52 }
  0x97   : > { %269 = vmatprep.subr.bf16.mxu0 %v242_v54  ;;  %v258_v57 = vsel %vm256_vm8, %v243_v56, 0 }
  0x98   : > { %270 = vmatpush1.bf16.msra.mxu0 %v241_v55 }
  0x99   : > { %384 = vmatprep.subr.msk.bf16.mxu0 %vm256_vm8, %v244_v53 }
  0x9c   : > { %272 = vmatpush1.bf16.msra.mxu0 %v258_v57 }
  0x9f   : > { %385 = vmatmul.mubr.msk.bf16.vlgmr.msra.gmra.mrb[0].mxu0 %vm252_vm9, %v245_v58 }
  0xa2   : > { %v250_v59 = vpop.permute.xlu0 %249 }
 0x172   : > { %v297_v60 = vpop.f32.mrb[0].mxu0 }
 0x173   : > { %v298_v61 = vadd.f32 %v297_v60, %v250_v59  ;;  %v299_v62 = vpop.f32.mrb[1].mxu0 }
 0x174   : > { %v300_v63 = vadd.f32 %v299_v62, %v250_v59  ;;  %v301_v0 = vpop.f32.mrb[2].mxu0 }
 0x175   : > { %vm304_vm10 = vcmp.ge.f32.partialorder %v298_v61, 0.0  ;;  %v306_v1 = vmul.f32 0.1, %v298_v61  ;;  %v302_v2 = vpop.f32.mrb[3].mxu0 }
 0x176   : > { %vm305_vm11 = vcmp.ge.f32.partialorder %v300_v63, 0.0  ;;  %v307_v3 = vmul.f32 0.1, %v300_v63 }
 0x177   : > { %v308_v4 = vsel %vm304_vm10, %v298_v61, %v306_v1 }
 0x178   : > { %v309_v5 = vsel %vm305_vm11, %v300_v63, %v307_v3 }
 0x179   : > { %v389_v6 = vpack.c.bf16 %v309_v5, %v308_v4 }
 0x17b   : > { %318 = vst [vmem:[%s172_s7] sm:$0xff] %v389_v6 }
 0x17c PF: > { %s13_s12 = sadd.s32 1, %s454_s12  }
 0x17d   : > { %p10_p4 = scmp.ge.s32.totalorder %s13_s12, 4  }
 0x17f   :  { %12 = sbr.rel (!%p10_p4) target bundleno = 1 (0x1), region = 62 }

// kernel: cls_forward.8
= control target key start
LH: loop header
LB: loop body
LE: loop exit
PB: predicated region body
PF: predicated region fallthrough
CT: control target
= control target key end

     0   :  { %s486_s12 = smov 0   ;;  %s522_s0 = inlined_call_operand.vmem [shape: bf16[8,512], index: 0, kind: input, shape index: {}]   ;;  %s523_s1 = inlined_call_operand.vmem [shape: bf16[8,72], index: 1, kind: input, shape index: {}]   ;;  %s524_s2 = inlined_call_operand.vmem [shape: f32[8,1], index: 2, kind: input, shape index: {}]   ;;  %s525_s3 = inlined_call_operand.vmem [shape: bf16[8,512], index: 3, kind: output, shape index: {}]  }
   0x1 LB: > { %s376_s13 = sadd.s32 4294967295, %s455_s12   ;;  %p380_p0 = scmp.ge.s32.totalorder %s455_s12, 1  ;;  %s455_s12 = sphi %s486_s12, %s13_s12  }
   0x2   : > { %p138_p1 = scmp.lt.s32.totalorder %s455_s12, 3 }
   0x4   : > { %p139_p2 = pnand %p380_p0, %p138_p1 }
   0x5   : > { %s381_s14 = sshll.u32 (!%p139_p2), %s376_s13, 1  ;;  %s457_s19 = smov (!%p139_p2), 127   ;;  %v463_v4 = vmov (!%p139_p2), 0   ;;  %v247_v5 = vld [vmem:[%s524_s2] sm:$0xff] (!%p139_p2)  ;;  %v182_v6 = vlaneseq (!%p139_p2)  ;;  %vm257_vm8 = vcmask (!%p139_p2), 1043456   ;;  %vm253_vm9 = vcmask (!%p139_p2), 588800  }
   0x6   : > { %142 = sbr.rel (%p139_p2) target bundleno = 382 (0x17e), region = 32  ;;  %p163_p3 = scmp.lt.s32.totalorder (!%p139_p2), %s381_s14, 3  ;;  %296 = vmatprep.mubr.bf16.mxu0 (!%p139_p2), %v463_v4  ;;  %448 = vset.pattern.permute.xlu0 (!%p139_p2), %v463_v4  ;;  %v246_v59 = vld [vmem:[%s523_s1] sm:$0xf] (!%p139_p2) }
   0x7   : > { %s458_s20 = smov (!%p139_p2), 112   ;;  %s459_s21 = smov (!%p139_p2), 126   ;;  %v183_v7 = vand.u32 (!%p139_p2), 127, %v182_v6 }
   0x8   : > { %s460_s22 = smov (!%p139_p2), 111   ;;  %s461_s23 = smov (!%p139_p2), 110  }
   0x9   : > { %s462_s24 = smov (!%p139_p2), 96   ;;  %s464_s25 = smov (!%p139_p2), 95   ;;  %vm184_vm0 = vcmp.lt.s32.totalorder (!%p139_p2), %v183_v7, 127  ;;  %vm198_vm1 = vcmp.lt.s32.totalorder (!%p139_p2), %v183_v7, 112  ;;  %vm191_vm2 = vcmp.lt.s32.totalorder (!%p139_p2), %v183_v7, 126  ;;  %vm205_vm3 = vcmp.lt.s32.totalorder (!%p139_p2), %v183_v7, 111 }
   0xa   : > { %s465_s26 = smov (!%p139_p2), 94   ;;  %vm212_vm4 = vcmp.lt.s32.totalorder (!%p139_p2), %v183_v7, 110  ;;  %vm219_vm5 = vcmp.lt.s32.totalorder (!%p139_p2), %v183_v7, 96  ;;  %vm233_vm6 = vcmp.lt.s32.totalorder (!%p139_p2), %v183_v7, 94  ;;  %vm226_vm7 = vcmp.lt.s32.totalorder (!%p139_p2), %v183_v7, 95 }
   0xd   : > { %s527_s14 = smov (!%p163_p3, %s381_s14), 3 }
   0xe   : > { %s382_s15 = sshll.u32 %s527_s14, 2 }
   0xf   : > { %s166_s18 = scalar_lea.vmem %s522_s0, %s382_s15  ;;  %s172_s6 = scalar_lea.vmem %s525_s3, %s382_s15 }
  0x10   : > { %v175_v0 = vld [vmem:[%s166_s18] sm:$0xff] }
  0x11   : > { %v176_v1 = vunpack.c.l.bf16 %v175_v0  ;;  %v177_v2 = vunpack.c.h.bf16 %v175_v0 }
  0x13   : > { %v408_v3 = vpack.i.bf16 %v177_v2, %v176_v1 }
  0x15   : > { %409 = vrot.lane.b32.xlu0 %v408_v3, %s457_s19  ;;  %419 = vrot.lane.b32.xlu1 %v408_v3, %s458_s20 }
  0x19   : > { %414 = vrot.lane.b32.xlu0 %v408_v3, %s459_s21  ;;  %424 = vrot.lane.b32.xlu1 %v408_v3, %s460_s22 }
  0x1d   : > { %429 = vrot.lane.b32.xlu0 %v408_v3, %s461_s23  ;;  %434 = vrot.lane.b32.xlu1 %v408_v3, %s462_s24 }
  0x21   : > { %439 = vrot.lane.b32.xlu0 %v408_v3, %s464_s25  ;;  %444 = vrot.lane.b32.xlu1 %v408_v3, %s465_s26 }
  0x25   : > { %250 = vperm.xlu0 %448, %v247_v5  }
  0x87   : > { %v410_v8 = vpop.permute.xlu0 %409  ;;  %v420_v9 = vpop.permute.xlu1 %419 }
  0x88   : > { %v412_v10 = vunpack.i.h.bf16 %v410_v8  ;;  %v411_v11 = vunpack.i.l.bf16 %v410_v8  ;;  %v422_v12 = vunpack.i.h.bf16 %v420_v9  ;;  %v421_v13 = vunpack.i.l.bf16 %v420_v9 }
  0x8a   : > { %v186_v14 = vsel %vm184_vm0, %v412_v10, %v411_v11  ;;  %v185_v15 = vsel %vm184_vm0, %v411_v11, %v412_v10  ;;  %v200_v20 = vsel %vm198_vm1, %v422_v12, %v421_v13  ;;  %v199_v21 = vsel %vm198_vm1, %v421_v13, %v422_v12 }
  0x8b   : > { %v415_v16 = vpop.permute.xlu0 %414  ;;  %v237_v17 = vpack.c.bf16 %v186_v14, %v177_v2  ;;  %v236_v18 = vpack.c.bf16 %v185_v15, %v176_v1  ;;  %v425_v19 = vpop.permute.xlu1 %424 }
  0x8c   : > { %v417_v22 = vunpack.i.h.bf16 %v415_v16  ;;  %v416_v23 = vunpack.i.l.bf16 %v415_v16  ;;  %v427_v24 = vunpack.i.h.bf16 %v425_v19  ;;  %v426_v25 = vunpack.i.l.bf16 %v425_v19 }
  0x8d   : > { %264 = vmatprep.subr.bf16.mxu0 %v237_v17 }
  0x8e   : > { %265 = vmatpush1.bf16.msra.mxu0 %v236_v18  ;;  %v193_v26 = vsel %vm191_vm2, %v417_v22, %v416_v23  ;;  %v192_v27 = vsel %vm191_vm2, %v416_v23, %v417_v22  ;;  %v207_v32 = vsel %vm205_vm3, %v427_v24, %v426_v25  ;;  %v206_v33 = vsel %vm205_vm3, %v426_v25, %v427_v24 }
  0x8f   : > { %v430_v28 = vpop.permute.xlu0 %429  ;;  %v239_v29 = vpack.c.bf16 %v200_v20, %v193_v26  ;;  %v238_v30 = vpack.c.bf16 %v199_v21, %v192_v27  ;;  %v435_v31 = vpop.permute.xlu1 %434 }
  0x90   : > { %v432_v34 = vunpack.i.h.bf16 %v430_v28  ;;  %v431_v35 = vunpack.i.l.bf16 %v430_v28  ;;  %v437_v36 = vunpack.i.h.bf16 %v435_v31  ;;  %v436_v37 = vunpack.i.l.bf16 %v435_v31 }
  0x91   : > { %266 = vmatprep.subr.bf16.mxu0 %v239_v29 }
  0x92   : > { %267 = vmatpush1.bf16.msra.mxu0 %v238_v30  ;;  %v214_v38 = vsel %vm212_vm4, %v432_v34, %v431_v35  ;;  %v213_v39 = vsel %vm212_vm4, %v431_v35, %v432_v34  ;;  %v221_v44 = vsel %vm219_vm5, %v437_v36, %v436_v37  ;;  %v220_v45 = vsel %vm219_vm5, %v436_v37, %v437_v36 }
  0x93   : > { %v440_v40 = vpop.permute.xlu0 %439  ;;  %v241_v41 = vpack.c.bf16 %v214_v38, %v207_v32  ;;  %v240_v42 = vpack.c.bf16 %v213_v39, %v206_v33  ;;  %v445_v43 = vpop.permute.xlu1 %444 }
  0x94   : > { %v442_v46 = vunpack.i.h.bf16 %v440_v40  ;;  %v441_v47 = vunpack.i.l.bf16 %v440_v40  ;;  %v447_v48 = vunpack.i.h.bf16 %v445_v43  ;;  %v446_v49 = vunpack.i.l.bf16 %v445_v43 }
  0x95   : > { %268 = vmatprep.subr.bf16.mxu0 %v241_v41 }
  0x96   : > { %269 = vmatpush1.bf16.msra.mxu0 %v240_v42  ;;  %v235_v50 = vsel %vm233_vm6, %v447_v48, %v446_v49  ;;  %v228_v51 = vsel %vm226_vm7, %v442_v46, %v441_v47  ;;  %v227_v52 = vsel %vm226_vm7, %v441_v47, %v442_v46  ;;  %v234_v53 = vsel %vm233_vm6, %v446_v49, %v447_v48 }
  0x97   : > { %v245_v54 = vpack.c.bf16 %v235_v50, %v235_v50  ;;  %v243_v55 = vpack.c.bf16 %v228_v51, %v221_v44  ;;  %v242_v56 = vpack.c.bf16 %v227_v52, %v220_v45  ;;  %v244_v57 = vpack.c.bf16 %v234_v53, %v234_v53 }
  0x99   : > { %270 = vmatprep.subr.bf16.mxu0 %v243_v55  ;;  %v259_v58 = vsel %vm257_vm8, %v244_v57, 0 }
  0x9a   : > { %271 = vmatpush1.bf16.msra.mxu0 %v242_v56 }
  0x9b   : > { %385 = vmatprep.subr.msk.bf16.mxu0 %vm257_vm8, %v245_v54 }
  0x9e   : > { %273 = vmatpush1.bf16.msra.mxu0 %v259_v58 }
  0xa1   : > { %386 = vmatmul.mubr.msk.bf16.vlgmr.msra.gmra.mrb[0].mxu0 %vm253_vm9, %v246_v59 }
  0xa4   : > { %v251_v60 = vpop.permute.xlu0 %250 }
 0x174   : > { %v298_v61 = vpop.f32.mrb[0].mxu0 }
 0x175   : > { %v299_v62 = vadd.f32 %v298_v61, %v251_v60  ;;  %v300_v63 = vpop.f32.mrb[1].mxu0 }
 0x176   : > { %v301_v0 = vadd.f32 %v300_v63, %v251_v60  ;;  %v302_v1 = vpop.f32.mrb[2].mxu0 }
 0x177   : > { %vm305_vm10 = vcmp.ge.f32.partialorder %v299_v62, 0.0  ;;  %v307_v2 = vmul.f32 0.1, %v299_v62  ;;  %v303_v3 = vpop.f32.mrb[3].mxu0 }
 0x178   : > { %vm306_vm11 = vcmp.ge.f32.partialorder %v301_v0, 0.0  ;;  %v308_v4 = vmul.f32 0.1, %v301_v0 }
 0x179   : > { %v309_v5 = vsel %vm305_vm10, %v299_v62, %v307_v2 }
 0x17a   : > { %v310_v6 = vsel %vm306_vm11, %v301_v0, %v308_v4 }
 0x17b   : > { %v390_v7 = vpack.c.bf16 %v310_v6, %v309_v5 }
 0x17d   : > { %319 = vst [vmem:[%s172_s6] sm:$0xff] %v390_v7 }
 0x17e PF: > { %s13_s12 = sadd.s32 1, %s455_s12  }
 0x17f   : > { %p10_p4 = scmp.ge.s32.totalorder %s13_s12, 4  }
 0x181   :  { %12 = sbr.rel (!%p10_p4) target bundleno = 1 (0x1), region = 62 }

// kernel: cls_forward.9
= control target key start
LH: loop header
LB: loop body
LE: loop exit
PB: predicated region body
PF: predicated region fallthrough
CT: control target
= control target key end

     0   :  { %s471_s12 = smov 0   ;;  %s504_s0 = inlined_call_operand.vmem [shape: bf16[8,512], index: 0, kind: input, shape index: {}]   ;;  %s505_s1 = inlined_call_operand.vmem [shape: bf16[8,72], index: 1, kind: input, shape index: {}]   ;;  %s506_s2 = inlined_call_operand.vmem [shape: f32[8,1], index: 2, kind: input, shape index: {}]   ;;  %s507_s3 = inlined_call_operand.vmem [shape: f32[8,512], index: 3, kind: output, shape index: {}]  }
   0x1 LB: > { %s363_s13 = sadd.s32 4294967295, %s440_s12   ;;  %p367_p0 = scmp.ge.s32.totalorder %s440_s12, 1  ;;  %s440_s12 = sphi %s471_s12, %s13_s12  }
   0x2   : > { %p138_p1 = scmp.lt.s32.totalorder %s440_s12, 3 }
   0x4   : > { %p139_p2 = pnand %p367_p0, %p138_p1 }
   0x5   : > { %s368_s14 = sshll.u32 (!%p139_p2), %s363_s13, 1  ;;  %s442_s19 = smov (!%p139_p2), 127   ;;  %v448_v4 = vmov (!%p139_p2), 0   ;;  %v247_v5 = vld [vmem:[%s506_s2] sm:$0xff] (!%p139_p2)  ;;  %v182_v6 = vlaneseq (!%p139_p2)  ;;  %vm257_vm8 = vcmask (!%p139_p2), 1043456   ;;  %vm253_vm9 = vcmask (!%p139_p2), 588800  }
   0x6   : > { %142 = sbr.rel (%p139_p2) target bundleno = 377 (0x179), region = 32  ;;  %p163_p3 = scmp.lt.s32.totalorder (!%p139_p2), %s368_s14, 3  ;;  %296 = vmatprep.mubr.bf16.mxu0 (!%p139_p2), %v448_v4  ;;  %433 = vset.pattern.permute.xlu0 (!%p139_p2), %v448_v4  ;;  %v246_v59 = vld [vmem:[%s505_s1] sm:$0xf] (!%p139_p2) }
   0x7   : > { %s443_s20 = smov (!%p139_p2), 112   ;;  %s444_s21 = smov (!%p139_p2), 126   ;;  %v183_v7 = vand.u32 (!%p139_p2), 127, %v182_v6 }
   0x8   : > { %s445_s22 = smov (!%p139_p2), 111   ;;  %s446_s23 = smov (!%p139_p2), 110  }
   0x9   : > { %s447_s24 = smov (!%p139_p2), 96   ;;  %s449_s25 = smov (!%p139_p2), 95   ;;  %vm184_vm0 = vcmp.lt.s32.totalorder (!%p139_p2), %v183_v7, 127  ;;  %vm198_vm1 = vcmp.lt.s32.totalorder (!%p139_p2), %v183_v7, 112  ;;  %vm191_vm2 = vcmp.lt.s32.totalorder (!%p139_p2), %v183_v7, 126  ;;  %vm205_vm3 = vcmp.lt.s32.totalorder (!%p139_p2), %v183_v7, 111 }
   0xa   : > { %s450_s26 = smov (!%p139_p2), 94   ;;  %vm212_vm4 = vcmp.lt.s32.totalorder (!%p139_p2), %v183_v7, 110  ;;  %vm219_vm5 = vcmp.lt.s32.totalorder (!%p139_p2), %v183_v7, 96  ;;  %vm233_vm6 = vcmp.lt.s32.totalorder (!%p139_p2), %v183_v7, 94  ;;  %vm226_vm7 = vcmp.lt.s32.totalorder (!%p139_p2), %v183_v7, 95 }
   0xd   : > { %s509_s14 = smov (!%p163_p3, %s368_s14), 3 }
   0xe   : > { %s369_s15 = sshll.u32 %s509_s14, 2  ;;  %s371_s4 = sshll.u32 %s509_s14, 3 }
   0xf   : > { %s166_s18 = scalar_lea.vmem %s504_s0, %s369_s15  ;;  %s172_s7 = scalar_lea.vmem %s507_s3, %s371_s4 }
  0x10   : > { %v175_v0 = vld [vmem:[%s166_s18] sm:$0xff] }
  0x11   : > { %v176_v1 = vunpack.c.l.bf16 %v175_v0  ;;  %v177_v2 = vunpack.c.h.bf16 %v175_v0 }
  0x13   : > { %v393_v3 = vpack.i.bf16 %v177_v2, %v176_v1 }
  0x15   : > { %394 = vrot.lane.b32.xlu0 %v393_v3, %s442_s19  ;;  %404 = vrot.lane.b32.xlu1 %v393_v3, %s443_s20 }
  0x19   : > { %399 = vrot.lane.b32.xlu0 %v393_v3, %s444_s21  ;;  %409 = vrot.lane.b32.xlu1 %v393_v3, %s445_s22 }
  0x1d   : > { %414 = vrot.lane.b32.xlu0 %v393_v3, %s446_s23  ;;  %419 = vrot.lane.b32.xlu1 %v393_v3, %s447_s24 }
  0x21   : > { %424 = vrot.lane.b32.xlu0 %v393_v3, %s449_s25  ;;  %429 = vrot.lane.b32.xlu1 %v393_v3, %s450_s26 }
  0x25   : > { %250 = vperm.xlu0 %433, %v247_v5  }
  0x87   : > { %v395_v8 = vpop.permute.xlu0 %394  ;;  %v405_v9 = vpop.permute.xlu1 %404 }
  0x88   : > { %v397_v10 = vunpack.i.h.bf16 %v395_v8  ;;  %v396_v11 = vunpack.i.l.bf16 %v395_v8  ;;  %v407_v12 = vunpack.i.h.bf16 %v405_v9  ;;  %v406_v13 = vunpack.i.l.bf16 %v405_v9 }
  0x8a   : > { %v186_v14 = vsel %vm184_vm0, %v397_v10, %v396_v11  ;;  %v185_v15 = vsel %vm184_vm0, %v396_v11, %v397_v10  ;;  %v200_v20 = vsel %vm198_vm1, %v407_v12, %v406_v13  ;;  %v199_v21 = vsel %vm198_vm1, %v406_v13, %v407_v12 }
  0x8b   : > { %v400_v16 = vpop.permute.xlu0 %399  ;;  %v237_v17 = vpack.c.bf16 %v186_v14, %v177_v2  ;;  %v236_v18 = vpack.c.bf16 %v185_v15, %v176_v1  ;;  %v410_v19 = vpop.permute.xlu1 %409 }
  0x8c   : > { %v402_v22 = vunpack.i.h.bf16 %v400_v16  ;;  %v401_v23 = vunpack.i.l.bf16 %v400_v16  ;;  %v412_v24 = vunpack.i.h.bf16 %v410_v19  ;;  %v411_v25 = vunpack.i.l.bf16 %v410_v19 }
  0x8d   : > { %264 = vmatprep.subr.bf16.mxu0 %v237_v17 }
  0x8e   : > { %265 = vmatpush1.bf16.msra.mxu0 %v236_v18  ;;  %v193_v26 = vsel %vm191_vm2, %v402_v22, %v401_v23  ;;  %v192_v27 = vsel %vm191_vm2, %v401_v23, %v402_v22  ;;  %v207_v32 = vsel %vm205_vm3, %v412_v24, %v411_v25  ;;  %v206_v33 = vsel %vm205_vm3, %v411_v25, %v412_v24 }
  0x8f   : > { %v415_v28 = vpop.permute.xlu0 %414  ;;  %v239_v29 = vpack.c.bf16 %v200_v20, %v193_v26  ;;  %v238_v30 = vpack.c.bf16 %v199_v21, %v192_v27  ;;  %v420_v31 = vpop.permute.xlu1 %419 }
  0x90   : > { %v417_v34 = vunpack.i.h.bf16 %v415_v28  ;;  %v416_v35 = vunpack.i.l.bf16 %v415_v28  ;;  %v422_v36 = vunpack.i.h.bf16 %v420_v31  ;;  %v421_v37 = vunpack.i.l.bf16 %v420_v31 }
  0x91   : > { %266 = vmatprep.subr.bf16.mxu0 %v239_v29 }
  0x92   : > { %267 = vmatpush1.bf16.msra.mxu0 %v238_v30  ;;  %v214_v38 = vsel %vm212_vm4, %v417_v34, %v416_v35  ;;  %v213_v39 = vsel %vm212_vm4, %v416_v35, %v417_v34  ;;  %v221_v44 = vsel %vm219_vm5, %v422_v36, %v421_v37  ;;  %v220_v45 = vsel %vm219_vm5, %v421_v37, %v422_v36 }
  0x93   : > { %v425_v40 = vpop.permute.xlu0 %424  ;;  %v241_v41 = vpack.c.bf16 %v214_v38, %v207_v32  ;;  %v240_v42 = vpack.c.bf16 %v213_v39, %v206_v33  ;;  %v430_v43 = vpop.permute.xlu1 %429 }
  0x94   : > { %v427_v46 = vunpack.i.h.bf16 %v425_v40  ;;  %v426_v47 = vunpack.i.l.bf16 %v425_v40  ;;  %v432_v48 = vunpack.i.h.bf16 %v430_v43  ;;  %v431_v49 = vunpack.i.l.bf16 %v430_v43 }
  0x95   : > { %268 = vmatprep.subr.bf16.mxu0 %v241_v41 }
  0x96   : > { %269 = vmatpush1.bf16.msra.mxu0 %v240_v42  ;;  %v235_v50 = vsel %vm233_vm6, %v432_v48, %v431_v49  ;;  %v228_v51 = vsel %vm226_vm7, %v427_v46, %v426_v47  ;;  %v227_v52 = vsel %vm226_vm7, %v426_v47, %v427_v46  ;;  %v234_v53 = vsel %vm233_vm6, %v431_v49, %v432_v48 }
  0x97   : > { %v245_v54 = vpack.c.bf16 %v235_v50, %v235_v50  ;;  %v243_v55 = vpack.c.bf16 %v228_v51, %v221_v44  ;;  %v242_v56 = vpack.c.bf16 %v227_v52, %v220_v45  ;;  %v244_v57 = vpack.c.bf16 %v234_v53, %v234_v53 }
  0x99   : > { %270 = vmatprep.subr.bf16.mxu0 %v243_v55  ;;  %v259_v58 = vsel %vm257_vm8, %v244_v57, 0 }
  0x9a   : > { %271 = vmatpush1.bf16.msra.mxu0 %v242_v56 }
  0x9b   : > { %372 = vmatprep.subr.msk.bf16.mxu0 %vm257_vm8, %v245_v54 }
  0x9e   : > { %273 = vmatpush1.bf16.msra.mxu0 %v259_v58 }
  0xa1   : > { %373 = vmatmul.mubr.msk.bf16.vlgmr.msra.gmra.mrb[0].mxu0 %vm253_vm9, %v246_v59 }
  0xa4   : > { %v251_v60 = vpop.permute.xlu0 %250 }
 0x174   : > { %v298_v61 = vpop.f32.mrb[0].mxu0 }
 0x175   : > { %v299_v62 = vadd.f32 %v298_v61, %v251_v60  ;;  %v300_v63 = vpop.f32.mrb[1].mxu0 }
 0x176   : > { %v301_v0 = vadd.f32 %v300_v63, %v251_v60  ;;  %v302_v1 = vpop.f32.mrb[2].mxu0 }
 0x177   : > { %305 = vst [vmem:[%s172_s7] sm:$0xff] %v299_v62  ;;  %v303_v2 = vpop.f32.mrb[3].mxu0 }
 0x178   : > { %306 = vst [vmem:[%s172_s7 + $0x8] sm:$0xff] %v301_v0 }
 0x179 PF: > { %s13_s12 = sadd.s32 1, %s440_s12  }
 0x17a   : > { %p10_p4 = scmp.ge.s32.totalorder %s13_s12, 4  }
 0x17c   :  { %12 = sbr.rel (!%p10_p4) target bundleno = 1 (0x1), region = 62 }

// kernel: cls_forward.10
= control target key start
LH: loop header
LB: loop body
LE: loop exit
PB: predicated region body
PF: predicated region fallthrough
CT: control target
= control target key end

     0   :  { %s1001_s24 = smov 0   ;;  %s1544_s0 = inlined_call_operand.vmem [shape: f32[2,1,26,14], index: 0, kind: input, shape index: {}]   ;;  %s1545_s1 = inlined_call_operand.vmem [shape: f32[2,1,26,14], index: 1, kind: input, shape index: {}]   ;;  %s1546_s2 = inlined_call_operand.vmem [shape: f32[2,4,26,14], index: 2, kind: input, shape index: {}]   ;;  %s1547_s3 = inlined_call_operand.vmem [shape: f32[2,4,26,14], index: 3, kind: input, shape index: {}]   ;;  %s1548_s4 = inlined_call_operand.vmem [shape: f32[2,4,26,14], index: 4, kind: input, shape index: {}]   ;;  %s1549_s5 = inlined_call_operand.vmem [shape: f32[2,4,26,14], index: 5, kind: input, shape index: {}]   ;;  %s1550_s6 = inlined_call_operand.vmem [shape: f32[2,4,26,14], index: 6, kind: output, shape index: {0}]   ;;  %s1551_s7 = inlined_call_operand.vmem [shape: f32[2,4,26,14], index: 7, kind: output, shape index: {1}]  }
   0x1 LB: > { %s882_s25 = sadd.s32 4294967295, %s959_s24   ;;  %p886_p0 = scmp.ge.s32.totalorder %s959_s24, 1  ;;  %s959_s24 = sphi %s1001_s24, %s18_s24  }
   0x2   : > { %p290_p1 = scmp.lt.s32.totalorder %s959_s24, 3 }
   0x4   : > { %p291_p2 = pnand %p886_p0, %p290_p1 }
   0x6   : > { %294 = sbr.rel (%p291_p2) target bundleno = 81 (0x51), region = 44 }
   0xd   : > { %p352_p3 = scmp.lt.s32.totalorder %s882_s25, 1  ;;  %vm636_vm0 = vcmask 113664   ;;  %vm640_vm1 = vcmask 107520  }
   0xf   : > { %s1592_s25 = smov (!%p352_p3, %s882_s25), 1 }
  0x10   : > { %s905_s26 = sshll.u32 %s1592_s25, 5  ;;  %s1009_s27 = sshll.u32 %s1592_s25, 7 }
  0x11   : > { %s1014_s30 = scalar_lea.vmem %s1544_s0, %s905_s26  ;;  %s1019_s10 = scalar_lea.vmem %s1545_s1, %s905_s26 }
  0x12   : > { %s1025_s13 = scalar_lea.vmem %s1546_s2, %s1009_s27  ;;  %s1031_s16 = scalar_lea.vmem %s1547_s3, %s1009_s27  ;;  %v1034_v0 = vld [vmem:[%s1014_s30] sm:$0xff]  ;;  %v1040_v2 = vld [vmem:[%s1014_s30 + $0x8] sm:$0xff]  ;;  %v1094_v26 = vld [vmem:[%s1014_s30 + $0x10] sm:$0xff] }
  0x13   : > { %v1037_v1 = vld [vmem:[%s1019_s10] sm:$0xff]  ;;  %s1046_s19 = scalar_lea.vmem %s1548_s4, %s1009_s27  ;;  %s1052_s22 = scalar_lea.vmem %s1549_s5, %s1009_s27  ;;  %v464_v5 = vmul.f32 %v1034_v0, %v1034_v0  ;;  %v1061_v7 = vld [vmem:[%s1019_s10 + $0x8] sm:$0xff]  ;;  %v465_v8 = vmul.f32 %v1040_v2, %v1040_v2  ;;  %v1097_v27 = vld [vmem:[%s1019_s10 + $0x10] sm:$0xff]  ;;  %v466_v34 = vmul.f32 %v1094_v26, %v1094_v26 }
  0x14   : > { %v400_v3 = vld [vmem:[%s1025_s13] sm:$0xff]  ;;  %v468_v6 = vmul.f32 %v1037_v1, %v1037_v1  ;;  %v401_v13 = vld [vmem:[%s1025_s13 + $0x8] sm:$0xff]  ;;  %v469_v14 = vmul.f32 %v1061_v7, %v1061_v7  ;;  %v402_v28 = vld [vmem:[%s1025_s13 + $0x10] sm:$0xff]  ;;  %v470_v35 = vmul.f32 %v1097_v27, %v1097_v27  ;;  %s1224_s26 = scalar_lea.vmem %s1550_s6, %s1009_s27 }
  0x15   : > { %v416_v4 = vld [vmem:[%s1031_s16] sm:$0xff]  ;;  %v476_v11 = vmul.f32 %v400_v3, %v400_v3  ;;  %v417_v18 = vld [vmem:[%s1031_s16 + $0x8] sm:$0xff]  ;;  %v477_v21 = vmul.f32 %v401_v13, %v401_v13  ;;  %v418_v31 = vld [vmem:[%s1031_s16 + $0x10] sm:$0xff]  ;;  %v478_v38 = vmul.f32 %v402_v28, %v402_v28 }
  0x16   : > { %v1066_v9 = vld [vmem:[%s1046_s19] sm:$0xff]  ;;  %v508_v12 = vmul.f32 %v416_v4, %v416_v4  ;;  %v1074_v15 = vadd.f32 %v468_v6, %v464_v5  ;;  %v1082_v19 = vld [vmem:[%s1046_s19 + $0x8] sm:$0xff]  ;;  %v1087_v22 = vadd.f32 %v469_v14, %v465_v8  ;;  %v509_v23 = vmul.f32 %v417_v18, %v417_v18  ;;  %v1105_v32 = vld [vmem:[%s1046_s19 + $0x10] sm:$0xff] }
  0x17   : > { %v1069_v10 = vld [vmem:[%s1052_s22] sm:$0xff]  ;;  %v572_v16 = vmul.f32 %v1066_v9, %v1034_v0  ;;  %v1085_v20 = vld [vmem:[%s1052_s22 + $0x8] sm:$0xff]  ;;  %v573_v24 = vmul.f32 %v1082_v19, %v1040_v2  ;;  %v1108_v33 = vld [vmem:[%s1052_s22 + $0x10] sm:$0xff]  ;;  %v510_v39 = vmul.f32 %v418_v31, %v418_v31  ;;  %v1124_v44 = vadd.f32 %v470_v35, %v466_v34 }
  0x18   : > { %v588_v17 = vmul.f32 %v1069_v10, %v1037_v1  ;;  %v589_v25 = vmul.f32 %v1085_v20, %v1061_v7  ;;  %v492_v29 = vadd.f32 %v476_v11, %v1074_v15  ;;  %v493_v36 = vadd.f32 %v477_v21, %v1087_v22  ;;  %v1118_v40 = vld [vmem:[%s1014_s30 + $0x18] sm:$0x3]  ;;  %v404_v54 = vld [vmem:[%s1025_s13 + $0x20] sm:$0xff]  ;;  %v405_v61 = vld [vmem:[%s1025_s13 + $0x28] sm:$0xff]  ;;  %s1417_s30 = scalar_lea.vmem %s1551_s7, %s1009_s27 }
  0x19   : > { %v1121_v41 = vld [vmem:[%s1019_s10 + $0x18] sm:$0x3]  ;;  %v574_v45 = vmul.f32 %v1105_v32, %v1094_v26  ;;  %v590_v46 = vmul.f32 %v1108_v33, %v1097_v27  ;;  %v467_v51 = vmul.f32 %v1118_v40, %v1118_v40  ;;  %v420_v55 = vld [vmem:[%s1031_s16 + $0x20] sm:$0xff]  ;;  %v494_v57 = vadd.f32 %v478_v38, %v1124_v44  ;;  %v421_v4 = vld [vmem:[%s1031_s16 + $0x28] sm:$0xff] }
  0x1a   : > { %v1101_v30 = vadd.f32 %v588_v17, %v572_v16  ;;  %v1115_v37 = vadd.f32 %v589_v25, %v573_v24  ;;  %v403_v42 = vld [vmem:[%s1025_s13 + $0x18] sm:$0x3]  ;;  %v524_v43 = vadd.f32 %v508_v12, %v492_v29  ;;  %v525_v50 = vadd.f32 %v509_v23, %v493_v36  ;;  %v1144_v56 = vld [vmem:[%s1046_s19 + $0x20] sm:$0xff]  ;;  %v1161_v5 = vld [vmem:[%s1046_s19 + $0x28] sm:$0xff] }
  0x1b   : > { %v419_v47 = vld [vmem:[%s1031_s16 + $0x18] sm:$0x3]  ;;  %v471_v52 = vmul.f32 %v1121_v41, %v1121_v41  ;;  %v479_v53 = vmul.f32 %v403_v42, %v403_v42  ;;  %v1147_v58 = vadd.f32 %v590_v46, %v574_v45  ;;  %v1150_v60 = vld [vmem:[%s1052_s22 + $0x20] sm:$0xff]  ;;  %v526_v6 = vadd.f32 %v510_v39, %v494_v57  ;;  %v1166_v13 = vld [vmem:[%s1052_s22 + $0x28] sm:$0xff] }
  0x1c   : > { %v1132_v48 = vld [vmem:[%s1046_s19 + $0x18] sm:$0x3]  ;;  %921 = vrcp.f32 %v524_v43  ;;  %v511_v59 = vmul.f32 %v419_v47, %v419_v47  ;;  %v480_v8 = vmul.f32 %v404_v54, %v404_v54  ;;  %v512_v11 = vmul.f32 %v420_v55, %v420_v55  ;;  %v406_v21 = vld [vmem:[%s1025_s13 + $0x30] sm:$0xff]  ;;  %v408_v55 = vld [vmem:[%s1025_s13 + $0x40] sm:$0xff] }
  0x1d   : > { %v1135_v49 = vld [vmem:[%s1052_s22 + $0x18] sm:$0x3]  ;;  %923 = vrcp.f32 %v525_v50  ;;  %v1153_v62 = vadd.f32 %v471_v52, %v467_v51  ;;  %v575_v63 = vmul.f32 %v1132_v48, %v1118_v40  ;;  %v576_v12 = vmul.f32 %v1144_v56, %v1034_v0  ;;  %v422_v23 = vld [vmem:[%s1031_s16 + $0x30] sm:$0xff]  ;;  %v424_v57 = vld [vmem:[%s1031_s16 + $0x40] sm:$0xff] }
  0x1e   : > { %v591_v3 = vmul.f32 %v1135_v49, %v1121_v41  ;;  %v592_v17 = vmul.f32 %v1150_v60, %v1037_v1  ;;  %v481_v18 = vmul.f32 %v405_v61, %v405_v61  ;;  %v1176_v24 = vld [vmem:[%s1046_s19 + $0x30] sm:$0xff]  ;;  %925 = vrcp.f32 %v526_v6  ;;  %v407_v39 = vld [vmem:[%s1025_s13 + $0x38] sm:$0x3] }
  0x1f   : > { %v495_v14 = vadd.f32 %v479_v53, %v1153_v62  ;;  %v496_v25 = vadd.f32 %v480_v8, %v1074_v15  ;;  %v513_v28 = vmul.f32 %v421_v4, %v421_v4  ;;  %v577_v29 = vmul.f32 %v1161_v5, %v1040_v2  ;;  %v1182_v31 = vld [vmem:[%s1052_s22 + $0x30] sm:$0xff]  ;;  %v423_v42 = vld [vmem:[%s1031_s16 + $0x38] sm:$0x3]  ;;  %v1210_v4 = vld [vmem:[%s1052_s22 + $0x40] sm:$0xff] }
  0x20   : > { %v1169_v16 = vadd.f32 %v591_v3, %v575_v63  ;;  %v1184_v35 = vadd.f32 %v592_v17, %v576_v12  ;;  %v497_v36 = vadd.f32 %v481_v18, %v1087_v22  ;;  %v593_v38 = vmul.f32 %v1166_v13, %v1061_v7  ;;  %v1194_v50 = vld [vmem:[%s1046_s19 + $0x38] sm:$0x3]  ;;  %v1207_v3 = vld [vmem:[%s1046_s19 + $0x40] sm:$0xff]  ;;  %1566 = vst [vmem:[#allocation3_spill] sm:$0xff] %v1210_v4 }
  0x21   : > { %v527_v34 = vadd.f32 %v511_v59, %v495_v14  ;;  %v528_v43 = vadd.f32 %v512_v11, %v496_v25  ;;  %v482_v45 = vmul.f32 %v406_v21, %v406_v21  ;;  %v514_v46 = vmul.f32 %v422_v23, %v422_v23  ;;  %v1197_v51 = vld [vmem:[%s1052_s22 + $0x38] sm:$0x3]  ;;  %1565 = vst [vmem:[#allocation2_spill] sm:$0xff] %v1207_v3  ;;  %v409_v23 = vld [vmem:[%s1025_s13 + $0x48] sm:$0xff] }
  0x22   : > { %v578_v47 = vmul.f32 %v1176_v24, %v1094_v26  ;;  %v529_v52 = vadd.f32 %v513_v28, %v497_v36  ;;  %v1199_v53 = vadd.f32 %v593_v38, %v577_v29  ;;  %v594_v54 = vmul.f32 %v1182_v31, %v1097_v27  ;;  %v425_v25 = vld [vmem:[%s1031_s16 + $0x48] sm:$0xff] }
  0x23   : > { %927 = vrcp.f32 %v527_v34  ;;  %v498_v59 = vadd.f32 %v482_v45, %v1124_v44  ;;  %v483_v61 = vmul.f32 %v407_v39, %v407_v39  ;;  %v515_v63 = vmul.f32 %v423_v42, %v423_v42  ;;  %v1230_v28 = vld [vmem:[%s1046_s19 + $0x48] sm:$0xff] }
  0x24   : > { %929 = vrcp.f32 %v528_v43  ;;  %v1212_v6 = vadd.f32 %v594_v54, %v578_v47  ;;  %v579_v8 = vmul.f32 %v1194_v50, %v1118_v40  ;;  %v595_v11 = vmul.f32 %v1197_v51, %v1121_v41  ;;  %1567 = vst [vmem:[#allocation4_spill] sm:$0xff] %v1230_v28  ;;  %v1243_v42 = vld [vmem:[%s1052_s22 + $0x48] sm:$0xff]  ;;  %v410_v43 = vld [vmem:[%s1025_s13 + $0x50] sm:$0xff] }
  0x25   : > { %931 = vrcp.f32 %v529_v52  ;;  %v530_v14 = vadd.f32 %v514_v46, %v498_v59  ;;  %v499_v17 = vadd.f32 %v483_v61, %v1153_v62  ;;  %v484_v18 = vmul.f32 %v408_v55, %v408_v55  ;;  %1568 = vst [vmem:[#allocation5_spill] sm:$0xff] %v1243_v42  ;;  %v426_v47 = vld [vmem:[%s1031_s16 + $0x50] sm:$0xff] }
  0x26   : > { %v1218_v12 = vpop.eup %921  ;;  %v516_v21 = vmul.f32 %v424_v57, %v424_v57  ;;  %v1236_v36 = vadd.f32 %v595_v11, %v579_v8  ;;  %v580_v38 = vmul.f32 %v1207_v3, %v1034_v0  ;;  %v596_v39 = vmul.f32 %v1210_v4, %v1037_v1  ;;  %v1251_v52 = vld [vmem:[%s1046_s19 + $0x50] sm:$0xff]  ;;  %v1365_v4 = vld [vmem:[%s1052_s22 + $0x78] sm:$0x3] }
  0x27   : > { %v1232_v29 = vpop.eup %923  ;;  %v620_v34 = vmul.f32 %v1218_v12, %v1101_v30  ;;  %933 = vrcp.f32 %v530_v14  ;;  %v531_v46 = vadd.f32 %v515_v63, %v499_v17  ;;  %v500_v30 = vadd.f32 %v484_v18, %v1074_v15  ;;  %1569 = vst [vmem:[#allocation6_spill] sm:$0xff] %v1251_v52  ;;  %v1260_v59 = vld [vmem:[%s1052_s22 + $0x50] sm:$0xff]  ;;  %v411_v14 = vld [vmem:[%s1025_s13 + $0x58] sm:$0x3] }
  0x28   : > { %v621_v45 = vmul.f32 %v1232_v29, %v1115_v37  ;;  %v1255_v54 = vadd.f32 %v596_v39, %v580_v38  ;;  %v485_v55 = vmul.f32 %v409_v23, %v409_v23  ;;  %v517_v57 = vmul.f32 %v425_v25, %v425_v25  ;;  %1570 = vst [vmem:[#allocation7_spill] sm:$0xff] %v1260_v59  ;;  %v1262_v61 = vpop.eup %925  ;;  %v427_v17 = vld [vmem:[%s1031_s16 + $0x58] sm:$0x3] }
  0x29   : > { %637 = vst.msk [vmem:[%s1224_s26] sm:$0xff] %vm636_vm0, %v620_v34  ;;  %v581_v37 = vmul.f32 %v1230_v28, %v1040_v2  ;;  %935 = vrcp.f32 %v531_v46  ;;  %v532_v63 = vadd.f32 %v516_v21, %v500_v30  ;;  %v597_v8 = vmul.f32 %v1243_v42, %v1061_v7  ;;  %v1271_v18 = vld [vmem:[%s1046_s19 + $0x58] sm:$0x3] }
  0x2a   : > { %638 = vst.msk [vmem:[%s1224_s26 + $0x8] sm:$0xff] %vm636_vm0, %v621_v45  ;;  %v486_v11 = vmul.f32 %v410_v43, %v410_v43  ;;  %1571 = vst [vmem:[#allocation8_spill] sm:$0xff] %v1271_v18  ;;  %v622_v23 = vmul.f32 %v1262_v61, %v1147_v58  ;;  %v501_v25 = vadd.f32 %v485_v55, %v1087_v22  ;;  %v1279_v21 = vld [vmem:[%s1052_s22 + $0x58] sm:$0x3]  ;;  %v412_v58 = vld [vmem:[%s1025_s13 + $0x60] sm:$0xff] }
  0x2b   : > { %v518_v34 = vmul.f32 %v426_v47, %v426_v47  ;;  %v582_v38 = vmul.f32 %v1251_v52, %v1094_v26  ;;  %1572 = vst [vmem:[#allocation9_spill] sm:$0xff] %v1279_v21  ;;  %937 = vrcp.f32 %v532_v63  ;;  %v1281_v39 = vadd.f32 %v597_v8, %v581_v37  ;;  %v428_v63 = vld [vmem:[%s1031_s16 + $0x60] sm:$0xff] }
  0x2c   : > { %v502_v43 = vadd.f32 %v486_v11, %v1124_v44  ;;  %v598_v45 = vmul.f32 %v1260_v59, %v1097_v27  ;;  %639 = vst.msk [vmem:[%s1224_s26 + $0x10] sm:$0xff] %vm636_vm0, %v622_v23  ;;  %v533_v30 = vadd.f32 %v517_v57, %v501_v25  ;;  %v487_v47 = vmul.f32 %v411_v14, %v411_v14  ;;  %v1303_v14 = vld [vmem:[%s1046_s19 + $0x60] sm:$0xff]  ;;  %v413_v23 = vld [vmem:[%s1025_s13 + $0x68] sm:$0xff] }
  0x2d   : > { %v1287_v46 = vpop.eup %927  ;;  %v519_v55 = vmul.f32 %v427_v17, %v427_v17  ;;  %v583_v37 = vmul.f32 %v1271_v18, %v1118_v40  ;;  %v599_v57 = vmul.f32 %v1279_v21, %v1121_v41  ;;  %1573 = vst [vmem:[#allocation10_spill] sm:$0xff] %v1303_v14  ;;  %v1306_v17 = vld [vmem:[%s1052_s22 + $0x60] sm:$0xff]  ;;  %v584_v28 = vmul.f32 %v1303_v14, %v1034_v0 }
  0x2e   : > { %v1294_v8 = vpop.eup %929  ;;  %v623_v11 = vmul.f32 %v1287_v46, %v1169_v16  ;;  %v534_v52 = vadd.f32 %v518_v34, %v502_v43  ;;  %v1298_v59 = vadd.f32 %v598_v45, %v582_v38  ;;  %1574 = vst [vmem:[#allocation11_spill] sm:$0xff] %v1306_v17  ;;  %939 = vrcp.f32 %v533_v30  ;;  %v429_v38 = vld [vmem:[%s1031_s16 + $0x68] sm:$0xff] }
  0x2f   : > { %v1309_v25 = vpop.eup %931  ;;  %v624_v18 = vmul.f32 %v1294_v8, %v1184_v35  ;;  %v503_v16 = vadd.f32 %v487_v47, %v1153_v62  ;;  %v488_v34 = vmul.f32 %v412_v58, %v412_v58  ;;  %v1316_v43 = vld [vmem:[%s1046_s19 + $0x68] sm:$0xff]  ;;  %v1325_v35 = vadd.f32 %v599_v57, %v583_v37  ;;  %v1348_v57 = vld [vmem:[%s1052_s22 + $0x70] sm:$0xff] }
  0x30   : > { %1575 = vst [vmem:[#allocation12_spill] sm:$0xff] %v1309_v25  ;;  %1576 = vst [vmem:[#allocation13_spill] sm:$0xff] %v1316_v43  ;;  %v1319_v45 = vld [vmem:[%s1052_s22 + $0x68] sm:$0xff]  ;;  %v625_v21 = vmul.f32 %v1309_v25, %v1199_v53  ;;  %941 = vrcp.f32 %v534_v52  ;;  %v520_v30 = vmul.f32 %v428_v63, %v428_v63  ;;  %v414_v53 = vld [vmem:[%s1025_s13 + $0x70] sm:$0xff]  ;;  %v489_v37 = vmul.f32 %v413_v23, %v413_v23 }
  0x31   : > { %1577 = vst [vmem:[#allocation14_spill] sm:$0xff] %v1319_v45  ;;  %641 = vst.msk [vmem:[%s1224_s26 + $0x18] sm:$0x3] %vm640_vm1, %v623_v11  ;;  %v535_v58 = vadd.f32 %v519_v55, %v503_v16  ;;  %v504_v47 = vadd.f32 %v488_v34, %v1074_v15  ;;  %v600_v11 = vmul.f32 %v1306_v17, %v1037_v1  ;;  %v430_v52 = vld [vmem:[%s1031_s16 + $0x70] sm:$0xff]  ;;  %v1336_v42 = vpop.eup %933  ;;  %v415_v34 = vld [vmem:[%s1025_s13 + $0x78] sm:$0x3] }
  0x32   : > { %642 = vst.msk [vmem:[%s1224_s26 + $0x20] sm:$0xff] %vm636_vm0, %v624_v18  ;;  %643 = vst.msk [vmem:[%s1224_s26 + $0x28] sm:$0xff] %vm636_vm0, %v625_v21  ;;  %v521_v63 = vmul.f32 %v429_v38, %v429_v38  ;;  %v585_v15 = vmul.f32 %v1316_v43, %v1040_v2  ;;  %v601_v18 = vmul.f32 %v1319_v45, %v1061_v7  ;;  %v1345_v55 = vld [vmem:[%s1046_s19 + $0x70] sm:$0xff]  ;;  %v431_v38 = vld [vmem:[%s1031_s16 + $0x78] sm:$0x3] }
  0x33   : > { %v626_v16 = vmul.f32 %v1336_v42, %v1212_v6  ;;  %943 = vrcp.f32 %v535_v58  ;;  %v536_v21 = vadd.f32 %v520_v30, %v504_v47  ;;  %v1352_v23 = vadd.f32 %v600_v11, %v584_v28  ;;  %v1356_v14 = vpop.eup %935  ;;  %v1362_v25 = vld [vmem:[%s1046_s19 + $0x78] sm:$0x3] }
  0x34   : > { %v505_v43 = vadd.f32 %v489_v37, %v1087_v22  ;;  %v1359_v45 = vadd.f32 %v601_v18, %v585_v15  ;;  %v490_v17 = vmul.f32 %v414_v53, %v414_v53  ;;  %v522_v3 = vmul.f32 %v430_v52, %v430_v52 }
  0x35   : > { %644 = vst.msk [vmem:[%s1224_s26 + $0x30] sm:$0xff] %vm636_vm0, %v626_v16  ;;  %v627_v6 = vmul.f32 %v1356_v14, %v1236_v36  ;;  %945 = vrcp.f32 %v536_v21  ;;  %v586_v28 = vmul.f32 %v1345_v55, %v1094_v26  ;;  %v602_v22 = vmul.f32 %v1348_v57, %v1097_v27  ;;  %v1375_v30 = vpop.eup %937 }
  0x36   : > { %v537_v58 = vadd.f32 %v521_v63, %v505_v43  ;;  %v506_v47 = vadd.f32 %v490_v17, %v1124_v44  ;;  %v491_v11 = vmul.f32 %v415_v34, %v415_v34  ;;  %v523_v53 = vmul.f32 %v431_v38, %v431_v38 }
  0x37   : > { %645 = vst.msk [vmem:[%s1224_s26 + $0x38] sm:$0x3] %vm640_vm1, %v627_v6  ;;  %v628_v36 = vmul.f32 %v1375_v30, %v1255_v54  ;;  %v1382_v52 = vadd.f32 %v602_v22, %v586_v28  ;;  %v587_v37 = vmul.f32 %v1362_v25, %v1118_v40  ;;  %v603_v15 = vmul.f32 %v1365_v4, %v1121_v41 }
  0x38   : > { %947 = vrcp.f32 %v537_v58  ;;  %v538_v18 = vadd.f32 %v522_v3, %v506_v47  ;;  %v507_v43 = vadd.f32 %v491_v11, %v1153_v62  ;;  %v654_v44 = vmul.f32 %v1069_v10, %v1034_v0  ;;  %v1391_v17 = vpop.eup %939 }
  0x39   : > { %646 = vst.msk [vmem:[%s1224_s26 + $0x40] sm:$0xff] %vm636_vm0, %v628_v36  ;;  %v1395_v54 = vadd.f32 %v603_v15, %v587_v37  ;;  %v670_v63 = vmul.f32 %v1066_v9, %v1037_v1  ;;  %v655_v16 = vmul.f32 %v1085_v20, %v1040_v2  ;;  %v671_v62 = vmul.f32 %v1082_v19, %v1061_v7  ;;  %v1578_v37 = vld [vmem:[#allocation3_spill] sm:$0xff] }
  0x3a   : > { %v1403_v3 = vpop.eup %941  ;;  %v629_v10 = vmul.f32 %v1391_v17, %v1281_v39  ;;  %949 = vrcp.f32 %v538_v18  ;;  %v539_v21 = vadd.f32 %v523_v53, %v507_v43  ;;  %v656_v34 = vmul.f32 %v1108_v33, %v1094_v26  ;;  %v1580_v18 = vld [vmem:[#allocation2_spill] sm:$0xff] }
  0x3b   : > { %v630_v9 = vmul.f32 %v1403_v3, %v1298_v59  ;;  %v686_v38 = vsub.f32 %v654_v44, %v670_v63  ;;  %v687_v6 = vsub.f32 %v655_v16, %v671_v62  ;;  %v672_v20 = vmul.f32 %v1105_v32, %v1097_v27 }
  0x3c   : > { %647 = vst.msk [vmem:[%s1224_s26 + $0x48] sm:$0xff] %vm636_vm0, %v629_v10  ;;  %951 = vrcp.f32 %v539_v21  ;;  %v657_v19 = vmul.f32 %v1135_v49, %v1118_v40  ;;  %v673_v33 = vmul.f32 %v1132_v48, %v1121_v41  ;;  %v658_v59 = vmul.f32 %v1150_v60, %v1034_v0  ;;  %v1583_v21 = vld [vmem:[#allocation7_spill] sm:$0xff] }
  0x3d   : > { %v1427_v32 = vpop.eup %943  ;;  %648 = vst.msk [vmem:[%s1224_s26 + $0x50] sm:$0xff] %vm636_vm0, %v630_v9  ;;  %v702_v39 = vmul.f32 %v1218_v12, %v686_v38  ;;  %v703_v28 = vmul.f32 %v1232_v29, %v687_v6  ;;  %v688_v22 = vsub.f32 %v656_v34, %v672_v20  ;;  %v674_v58 = vmul.f32 %v1144_v56, %v1037_v1  ;;  %v1584_v20 = vld [vmem:[#allocation6_spill] sm:$0xff] }
  0x3e   : > { %v631_v49 = vmul.f32 %v1427_v32, %v1325_v35  ;;  %v689_v48 = vsub.f32 %v657_v19, %v673_v33  ;;  %v659_v60 = vmul.f32 %v1166_v13, %v1040_v2  ;;  %v675_v47 = vmul.f32 %v1161_v5, %v1061_v7 }
  0x3f   : > { %v1441_v11 = vpop.eup %945  ;;  %718 = vst.msk [vmem:[%s1417_s30] sm:$0xff] %vm636_vm0, %v702_v39  ;;  %719 = vst.msk [vmem:[%s1417_s30 + $0x8] sm:$0xff] %vm636_vm0, %v703_v28  ;;  %v704_v56 = vmul.f32 %v1262_v61, %v688_v22  ;;  %v690_v12 = vsub.f32 %v658_v59, %v674_v58  ;;  %v660_v29 = vmul.f32 %v1182_v31, %v1094_v26  ;;  %v1586_v39 = vld [vmem:[#allocation8_spill] sm:$0xff]  ;;  %v1587_v22 = vld [vmem:[#allocation11_spill] sm:$0xff] }
  0x40   : > { %v676_v13 = vmul.f32 %v1176_v24, %v1097_v27  ;;  %649 = vst.msk [vmem:[%s1224_s26 + $0x58] sm:$0x3] %vm640_vm1, %v631_v49  ;;  %v632_v5 = vmul.f32 %v1441_v11, %v1352_v23  ;;  %v705_v35 = vmul.f32 %v1287_v46, %v689_v48  ;;  %v691_v53 = vsub.f32 %v659_v60, %v675_v47  ;;  %v1579_v46 = vld [vmem:[#allocation12_spill] sm:$0xff] }
  0x41   : > { %v661_v61 = vmul.f32 %v1197_v51, %v1118_v40  ;;  %720 = vst.msk [vmem:[%s1417_s30 + $0x10] sm:$0xff] %vm636_vm0, %v704_v56  ;;  %v706_v36 = vmul.f32 %v1294_v8, %v690_v12  ;;  %v677_v24 = vmul.f32 %v1194_v50, %v1121_v41  ;;  %v662_v15 = vmul.f32 %v1578_v37, %v1034_v0  ;;  %v1581_v8 = vld [vmem:[#allocation5_spill] sm:$0xff]  ;;  %v1582_v50 = vld [vmem:[#allocation4_spill] sm:$0xff] }
  0x42   : > { %v692_v31 = vsub.f32 %v660_v29, %v676_v13  ;;  %v948_v23 = vpop.eup %947  ;;  %650 = vst.msk [vmem:[%s1224_s26 + $0x60] sm:$0xff] %vm636_vm0, %v632_v5  ;;  %v707_v51 = vmul.f32 %v1579_v46, %v691_v53  ;;  %v678_v43 = vmul.f32 %v1580_v18, %v1037_v1  ;;  %v663_v44 = vmul.f32 %v1581_v8, %v1040_v2 }
  0x43   : > { %721 = vst.msk [vmem:[%s1417_s30 + $0x18] sm:$0x3] %vm640_vm1, %v705_v35  ;;  %v679_v63 = vmul.f32 %v1582_v50, %v1061_v7  ;;  %v633_v16 = vmul.f32 %v948_v23, %v1359_v45  ;;  %v693_v10 = vsub.f32 %v661_v61, %v677_v24  ;;  %v664_v34 = vmul.f32 %v1583_v21, %v1094_v26  ;;  %v1585_v45 = vld [vmem:[#allocation9_spill] sm:$0xff] }
  0x44   : > { %722 = vst.msk [vmem:[%s1417_s30 + $0x20] sm:$0xff] %vm636_vm0, %v706_v36  ;;  %v708_v62 = vmul.f32 %v1336_v42, %v692_v31  ;;  %v950_v9 = vpop.eup %949  ;;  %723 = vst.msk [vmem:[%s1417_s30 + $0x28] sm:$0xff] %vm636_vm0, %v707_v51  ;;  %v694_v38 = vsub.f32 %v662_v15, %v678_v43  ;;  %v680_v19 = vmul.f32 %v1584_v20, %v1097_v27 }
  0x45   : > { %v695_v6 = vsub.f32 %v663_v44, %v679_v63  ;;  %v665_v33 = vmul.f32 %v1585_v45, %v1118_v40  ;;  %651 = vst.msk [vmem:[%s1224_s26 + $0x68] sm:$0xff] %vm636_vm0, %v633_v16  ;;  %v634_v42 = vmul.f32 %v950_v9, %v1382_v52  ;;  %v709_v59 = vmul.f32 %v1356_v14, %v693_v10  ;;  %v1588_v52 = vld [vmem:[#allocation10_spill] sm:$0xff] }
  0x46   : > { %724 = vst.msk [vmem:[%s1417_s30 + $0x30] sm:$0xff] %vm636_vm0, %v708_v62  ;;  %v681_v28 = vmul.f32 %v1586_v39, %v1121_v41  ;;  %v666_v58 = vmul.f32 %v1587_v22, %v1034_v0  ;;  %v952_v49 = vpop.eup %951  ;;  %v710_v48 = vmul.f32 %v1375_v30, %v694_v38  ;;  %v696_v47 = vsub.f32 %v664_v34, %v680_v19  ;;  %v1589_v0 = vld [vmem:[#allocation14_spill] sm:$0xff]  ;;  %v1590_v30 = vld [vmem:[#allocation13_spill] sm:$0xff] }
  0x47   : > { %v711_v60 = vmul.f32 %v1391_v17, %v695_v6  ;;  %v682_v56 = vmul.f32 %v1588_v52, %v1037_v1  ;;  %652 = vst.msk [vmem:[%s1224_s26 + $0x70] sm:$0xff] %vm636_vm0, %v634_v42  ;;  %v635_v14 = vmul.f32 %v952_v49, %v1395_v54  ;;  %v667_v29 = vmul.f32 %v1589_v0, %v1040_v2 }
  0x48   : > { %725 = vst.msk [vmem:[%s1417_s30 + $0x38] sm:$0x3] %vm640_vm1, %v709_v59  ;;  %v697_v12 = vsub.f32 %v665_v33, %v681_v28  ;;  %v683_v13 = vmul.f32 %v1590_v30, %v1061_v7  ;;  %v712_v1 = vmul.f32 %v1403_v3, %v696_v47  ;;  %v668_v54 = vmul.f32 %v1348_v57, %v1094_v26 }
  0x49   : > { %726 = vst.msk [vmem:[%s1417_s30 + $0x40] sm:$0xff] %vm636_vm0, %v710_v48  ;;  %727 = vst.msk [vmem:[%s1417_s30 + $0x48] sm:$0xff] %vm636_vm0, %v711_v60  ;;  %v698_v17 = vsub.f32 %v666_v58, %v682_v56  ;;  %v684_v5 = vmul.f32 %v1345_v55, %v1097_v27  ;;  %v669_v35 = vmul.f32 %v1365_v4, %v1118_v40 }
  0x4a   : > { %653 = vst.msk [vmem:[%s1224_s26 + $0x78] sm:$0x3] %vm640_vm1, %v635_v14  ;;  %v713_v2 = vmul.f32 %v1427_v32, %v697_v12  ;;  %v699_v7 = vsub.f32 %v667_v29, %v683_v13  ;;  %v685_v3 = vmul.f32 %v1362_v25, %v1121_v41 }
  0x4b   : > { %728 = vst.msk [vmem:[%s1417_s30 + $0x50] sm:$0xff] %vm636_vm0, %v712_v1  ;;  %v714_v26 = vmul.f32 %v1441_v11, %v698_v17  ;;  %v700_v57 = vsub.f32 %v668_v54, %v684_v5 }
  0x4c   : > { %729 = vst.msk [vmem:[%s1417_s30 + $0x58] sm:$0x3] %vm640_vm1, %v713_v2  ;;  %v715_v27 = vmul.f32 %v948_v23, %v699_v7  ;;  %v701_v55 = vsub.f32 %v669_v35, %v685_v3 }
  0x4d   : > { %730 = vst.msk [vmem:[%s1417_s30 + $0x60] sm:$0xff] %vm636_vm0, %v714_v26  ;;  %v716_v53 = vmul.f32 %v950_v9, %v700_v57 }
  0x4e   : > { %731 = vst.msk [vmem:[%s1417_s30 + $0x68] sm:$0xff] %vm636_vm0, %v715_v27  ;;  %v717_v32 = vmul.f32 %v952_v49, %v701_v55 }
  0x4f   : > { %732 = vst.msk [vmem:[%s1417_s30 + $0x70] sm:$0xff] %vm636_vm0, %v716_v53 }
  0x50   : > { %733 = vst.msk [vmem:[%s1417_s30 + $0x78] sm:$0x3] %vm640_vm1, %v717_v32 }
  0x51 PF: > { %s18_s24 = sadd.s32 1, %s959_s24  }
  0x52   : > { %p15_p4 = scmp.ge.s32.totalorder %s18_s24, 4  }
  0x54   :  { %17 = sbr.rel (!%p15_p4) target bundleno = 1 (0x1), region = 101 }

// kernel: reverse.0
= control target key start
LH: loop header
LB: loop body
LE: loop exit
PB: predicated region body
PF: predicated region fallthrough
CT: control target
= control target key end

     0   :  { %v104_v3 = vlaneseq  ;;  %v110_v18 = vld [vmem:[#allocation0 + $0x7] ss:$-1 sm:$0xff]  ;;  %v138_v19 = vld [vmem:[#allocation0 + $0x1f] ss:$-1 sm:$0xff]  ;;  %v166_v22 = vld [vmem:[#allocation0 + $0x37] ss:$-1 sm:$0xff]  ;;  %s617_s0 = inlined_call_operand.vmem [shape: f32[2,4,26,12], index: 0, kind: input, shape index: {}]   ;;  %s618_s1 = inlined_call_operand.vmem [shape: f32[2,4,26,12], index: 1, kind: output, shape index: {}]  }
   0x1   :  { %v60_v0 = vld [vmem:[%s617_s0] sm:$0xff]  ;;  %v62_v1 = vld [vmem:[%s617_s0 + $0x8] sm:$0xff]  ;;  %v64_v2 = vld [vmem:[%s617_s0 + $0x10] sm:$0xff]  ;;  %v111_v20 = vrot.slane %v110_v18, 4  ;;  %v139_v21 = vrot.slane %v138_v19, 4  ;;  %v167_v24 = vrot.slane %v166_v22, 4 }
   0x2   :  { %61 = vst [vmem:[#allocation0 + $0x8] sm:$0xff] %v60_v0  ;;  %63 = vst [vmem:[#allocation0 + $0x10] sm:$0xff] %v62_v1  ;;  %v66_v4 = vld [vmem:[%s617_s0 + $0x18] sm:$0xff]  ;;  %v68_v5 = vld [vmem:[%s617_s0 + $0x20] sm:$0xff]  ;;  %v513_v10 = vshrl.u32 %v104_v3, 7 }
   0x3   :  { %65 = vst [vmem:[#allocation0 + $0x20] sm:$0xff] %v64_v2  ;;  %v70_v6 = vld [vmem:[%s617_s0 + $0x28] sm:$0xff]  ;;  %67 = vst [vmem:[#allocation0 + $0x28] sm:$0xff] %v66_v4  ;;  %v72_v7 = vld [vmem:[%s617_s0 + $0x30] sm:$0xff] }
   0x4   :  { %69 = vst [vmem:[#allocation0 + $0x38] sm:$0xff] %v68_v5  ;;  %71 = vst [vmem:[#allocation0 + $0x40] sm:$0xff] %v70_v6  ;;  %v74_v8 = vld [vmem:[%s617_s0 + $0x38] sm:$0xff]  ;;  %v76_v9 = vld [vmem:[%s617_s0 + $0x40] sm:$0xff]  ;;  %vm106_vm0 = vcmp.lt.s32.totalorder %v513_v10, 4 }
   0x5   :  { %73 = vst [vmem:[#allocation0 + $0x50] sm:$0xff] %v72_v7  ;;  %75 = vst [vmem:[#allocation0 + $0x58] sm:$0xff] %v74_v8  ;;  %v78_v11 = vld [vmem:[%s617_s0 + $0x48] sm:$0xff]  ;;  %v80_v12 = vld [vmem:[%s617_s0 + $0x50] sm:$0xff] }
   0x6   :  { %77 = vst [vmem:[#allocation0 + $0x68] sm:$0xff] %v76_v9  ;;  %v82_v13 = vld [vmem:[%s617_s0 + $0x58] sm:$0xff]  ;;  %79 = vst [vmem:[#allocation0 + $0x70] sm:$0xff] %v78_v11  ;;  %v84_v14 = vld [vmem:[%s617_s0 + $0x60] sm:$0xff] }
   0x7   :  { %81 = vst [vmem:[#allocation0 + $0x80] sm:$0xff] %v80_v12  ;;  %83 = vst [vmem:[#allocation0 + $0x88] sm:$0xff] %v82_v13  ;;  %v86_v15 = vld [vmem:[%s617_s0 + $0x68] sm:$0xff]  ;;  %v88_v16 = vld [vmem:[%s617_s0 + $0x70] sm:$0xff] }
   0x8   :  { %85 = vst [vmem:[#allocation0 + $0x98] sm:$0xff] %v84_v14  ;;  %87 = vst [vmem:[#allocation0 + $0xa0] sm:$0xff] %v86_v15  ;;  %v90_v17 = vld [vmem:[%s617_s0 + $0x78] sm:$0xff]  ;;  %v194_v23 = vld [vmem:[#allocation0 + $0x4f] ss:$-1 sm:$0xff] }
   0x9   :  { %89 = vst [vmem:[#allocation0 + $0xb0] sm:$0xff] %v88_v16  ;;  %91 = vst [vmem:[#allocation0 + $0xb8] sm:$0xff] %v90_v17  ;;  %v195_v25 = vrot.slane %v194_v23, 4  ;;  %v222_v26 = vld [vmem:[#allocation0 + $0x67] ss:$-1 sm:$0xff] }
   0xa   :  { %v250_v27 = vld [vmem:[#allocation0 + $0x7f] ss:$-1 sm:$0xff]  ;;  %v97_v28 = vld [vmem:[#allocation0 + $0xf] ss:$-1 sm:$0xff]  ;;  %v102_v29 = vld [vmem:[#allocation0 + $0x17] ss:$-1 sm:$0xff] }
   0xb   :  { %112 = vst [vmem:[#allocation1 + $0x8] sm:$0xff] %v111_v20  ;;  %v115_v30 = vld [vmem:[#allocation0 + $0xf] ss:$-1 sm:$0xff]  ;;  %140 = vst [vmem:[#allocation1 + $0x18] sm:$0xff] %v139_v21  ;;  %v98_v31 = vrot.slane %v97_v28, 4  ;;  %v103_v32 = vrot.slane %v102_v29, 4 }
   0xc   :  { %v116_v33 = vrot.slane %v115_v30, 4  ;;  %v125_v34 = vld [vmem:[#allocation0 + $0x27] ss:$-1 sm:$0xff]  ;;  %168 = vst [vmem:[#allocation1 + $0x28] sm:$0xff] %v167_v24  ;;  %196 = vst [vmem:[#allocation1 + $0x38] sm:$0xff] %v195_v25  ;;  %v223_v35 = vrot.slane %v222_v26, 4 }
   0xd   :  { %v126_v36 = vrot.slane %v125_v34, 4  ;;  %v130_v37 = vld [vmem:[#allocation0 + $0x2f] ss:$-1 sm:$0xff]  ;;  %v143_v38 = vld [vmem:[#allocation0 + $0x27] ss:$-1 sm:$0xff]  ;;  %v251_v39 = vrot.slane %v250_v27, 4 }
   0xe   :  { %99 = vst [vmem:[#allocation1] sm:$0xff] %v98_v31  ;;  %120 = vst.msk [vmem:[#allocation1 + $0x8] sm:$0xff] %vm106_vm0, %v116_v33  ;;  %v131_v40 = vrot.slane %v130_v37, 4  ;;  %v144_v41 = vrot.slane %v143_v38, 4  ;;  %v153_v42 = vld [vmem:[#allocation0 + $0x3f] ss:$-1 sm:$0xff] }
   0xf   :  { %v158_v43 = vld [vmem:[#allocation0 + $0x47] ss:$-1 sm:$0xff]  ;;  %224 = vst [vmem:[#allocation1 + $0x48] sm:$0xff] %v223_v35  ;;  %107 = vst.msk [vmem:[#allocation1] sm:$0xff] %vm106_vm0, %v103_v32  ;;  %v154_v44 = vrot.slane %v153_v42, 4 }
  0x10   :  { %127 = vst [vmem:[#allocation1 + $0x10] sm:$0xff] %v126_v36  ;;  %v159_v45 = vrot.slane %v158_v43, 4  ;;  %v171_v46 = vld [vmem:[#allocation0 + $0x3f] ss:$-1 sm:$0xff]  ;;  %v181_v47 = vld [vmem:[#allocation0 + $0x57] ss:$-1 sm:$0xff] }
  0x11   :  { %252 = vst [vmem:[#allocation1 + $0x58] sm:$0xff] %v251_v39  ;;  %135 = vst.msk [vmem:[#allocation1 + $0x10] sm:$0xff] %vm106_vm0, %v131_v40  ;;  %v172_v48 = vrot.slane %v171_v46, 4  ;;  %v182_v49 = vrot.slane %v181_v47, 4  ;;  %v186_v50 = vld [vmem:[#allocation0 + $0x5f] ss:$-1 sm:$0xff] }
  0x12   :  { %148 = vst.msk [vmem:[#allocation1 + $0x18] sm:$0xff] %vm106_vm0, %v144_v41  ;;  %v199_v51 = vld [vmem:[#allocation0 + $0x57] ss:$-1 sm:$0xff]  ;;  %155 = vst [vmem:[#allocation1 + $0x20] sm:$0xff] %v154_v44  ;;  %v187_v52 = vrot.slane %v186_v50, 4 }
  0x13   :  { %v200_v53 = vrot.slane %v199_v51, 4  ;;  %v209_v54 = vld [vmem:[#allocation0 + $0x6f] ss:$-1 sm:$0xff]  ;;  %v214_v55 = vld [vmem:[#allocation0 + $0x77] ss:$-1 sm:$0xff]  ;;  %163 = vst.msk [vmem:[#allocation1 + $0x20] sm:$0xff] %vm106_vm0, %v159_v45 }
  0x14   :  { %176 = vst.msk [vmem:[#allocation1 + $0x28] sm:$0xff] %vm106_vm0, %v172_v48  ;;  %183 = vst [vmem:[#allocation1 + $0x30] sm:$0xff] %v182_v49  ;;  %v210_v56 = vrot.slane %v209_v54, 4  ;;  %v215_v57 = vrot.slane %v214_v55, 4  ;;  %v227_v58 = vld [vmem:[#allocation0 + $0x6f] ss:$-1 sm:$0xff] }
  0x15   :  { %v237_v59 = vld [vmem:[#allocation0 + $0x87] ss:$-1 sm:$0xff]  ;;  %191 = vst.msk [vmem:[#allocation1 + $0x30] sm:$0xff] %vm106_vm0, %v187_v52  ;;  %204 = vst.msk [vmem:[#allocation1 + $0x38] sm:$0xff] %vm106_vm0, %v200_v53  ;;  %v228_v60 = vrot.slane %v227_v58, 4  ;;  %v376_v20 = vld [vmem:[#allocation1 + $0x8] sm:$0xff] }
  0x16   :  { %v238_v61 = vrot.slane %v237_v59, 4  ;;  %v242_v62 = vld [vmem:[#allocation0 + $0x8f] ss:$-1 sm:$0xff]  ;;  %v255_v63 = vld [vmem:[#allocation0 + $0x87] ss:$-1 sm:$0xff]  ;;  %211 = vst [vmem:[#allocation1 + $0x40] sm:$0xff] %v210_v56 }
  0x17   :  { %v243_v0 = vrot.slane %v242_v62, 4  ;;  %v256_v1 = vrot.slane %v255_v63, 4  ;;  %v265_v2 = vld [vmem:[#allocation0 + $0x9f] ss:$-1 sm:$0xff]  ;;  %v270_v3 = vld [vmem:[#allocation0 + $0xa7] ss:$-1 sm:$0xff] }
  0x18   :  { %219 = vst.msk [vmem:[#allocation1 + $0x40] sm:$0xff] %vm106_vm0, %v215_v57  ;;  %232 = vst.msk [vmem:[#allocation1 + $0x48] sm:$0xff] %vm106_vm0, %v228_v60  ;;  %v266_v4 = vrot.slane %v265_v2, 4  ;;  %v271_v5 = vrot.slane %v270_v3, 4  ;;  %v278_v6 = vld [vmem:[#allocation0 + $0x97] ss:$-1 sm:$0xff] }
  0x19   :  { %239 = vst [vmem:[#allocation1 + $0x50] sm:$0xff] %v238_v61  ;;  %v283_v7 = vld [vmem:[#allocation0 + $0x9f] ss:$-1 sm:$0xff]  ;;  %260 = vst.msk [vmem:[#allocation1 + $0x58] sm:$0xff] %vm106_vm0, %v256_v1  ;;  %v279_v8 = vrot.slane %v278_v6, 4  ;;  %v374_v19 = vld [vmem:[#allocation1] sm:$0xff] }
  0x1a   :  { %247 = vst.msk [vmem:[#allocation1 + $0x50] sm:$0xff] %vm106_vm0, %v243_v0  ;;  %v284_v9 = vrot.slane %v283_v7, 4  ;;  %v293_v11 = vld [vmem:[#allocation0 + $0xb7] ss:$-1 sm:$0xff]  ;;  %v298_v12 = vld [vmem:[#allocation0 + $0xbf] ss:$-1 sm:$0xff]  ;;  %375 = vst [vmem:[%s618_s1] sm:$0xff] %v374_v19 }
  0x1b   :  { %267 = vst [vmem:[#allocation1 + $0x60] sm:$0xff] %v266_v4  ;;  %v294_v13 = vrot.slane %v293_v11, 4  ;;  %v299_v14 = vrot.slane %v298_v12, 4  ;;  %v306_v15 = vld [vmem:[#allocation0 + $0xaf] ss:$-1 sm:$0xff]  ;;  %280 = vst [vmem:[#allocation1 + $0x68] sm:$0xff] %v279_v8 }
  0x1c   :  { %v311_v16 = vld [vmem:[#allocation0 + $0xb7] ss:$-1 sm:$0xff]  ;;  %275 = vst.msk [vmem:[#allocation1 + $0x60] sm:$0xff] %vm106_vm0, %v271_v5  ;;  %v307_v17 = vrot.slane %v306_v15, 4  ;;  %288 = vst.msk [vmem:[#allocation1 + $0x68] sm:$0xff] %vm106_vm0, %v284_v9  ;;  %v380_v22 = vld [vmem:[#allocation1 + $0x18] sm:$0xff] }
  0x1d   :  { %v312_v18 = vrot.slane %v311_v16, 4  ;;  %v378_v21 = vld [vmem:[#allocation1 + $0x10] sm:$0xff]  ;;  %295 = vst [vmem:[#allocation1 + $0x70] sm:$0xff] %v294_v13  ;;  %377 = vst [vmem:[%s618_s1 + $0x8] sm:$0xff] %v376_v20  ;;  %v382_v23 = vld [vmem:[#allocation1 + $0x20] sm:$0xff] }
  0x1e   :  { %379 = vst [vmem:[%s618_s1 + $0x10] sm:$0xff] %v378_v21  ;;  %v384_v24 = vld [vmem:[#allocation1 + $0x28] sm:$0xff]  ;;  %303 = vst.msk [vmem:[#allocation1 + $0x70] sm:$0xff] %vm106_vm0, %v299_v14  ;;  %v386_v25 = vld [vmem:[#allocation1 + $0x30] sm:$0xff] }
  0x1f   :  { %308 = vst [vmem:[#allocation1 + $0x78] sm:$0xff] %v307_v17  ;;  %381 = vst [vmem:[%s618_s1 + $0x18] sm:$0xff] %v380_v22  ;;  %v388_v26 = vld [vmem:[#allocation1 + $0x38] sm:$0xff]  ;;  %v390_v10 = vld [vmem:[#allocation1 + $0x40] sm:$0xff] }
  0x20   :  { %383 = vst [vmem:[%s618_s1 + $0x20] sm:$0xff] %v382_v23  ;;  %385 = vst [vmem:[%s618_s1 + $0x28] sm:$0xff] %v384_v24  ;;  %v392_v27 = vld [vmem:[#allocation1 + $0x48] sm:$0xff]  ;;  %v396_v29 = vld [vmem:[#allocation1 + $0x58] sm:$0xff] }
  0x21   :  { %316 = vst.msk [vmem:[#allocation1 + $0x78] sm:$0xff] %vm106_vm0, %v312_v18  ;;  %387 = vst [vmem:[%s618_s1 + $0x30] sm:$0xff] %v386_v25  ;;  %v394_v28 = vld [vmem:[#allocation1 + $0x50] sm:$0xff] }
  0x22   :  { %389 = vst [vmem:[%s618_s1 + $0x38] sm:$0xff] %v388_v26  ;;  %391 = vst [vmem:[%s618_s1 + $0x40] sm:$0xff] %v390_v10 }
  0x23   :  { %393 = vst [vmem:[%s618_s1 + $0x48] sm:$0xff] %v392_v27  ;;  %395 = vst [vmem:[%s618_s1 + $0x50] sm:$0xff] %v394_v28  ;;  %v398_v30 = vld [vmem:[#allocation1 + $0x60] sm:$0xff]  ;;  %v400_v31 = vld [vmem:[#allocation1 + $0x68] sm:$0xff] }
  0x24   :  { %397 = vst [vmem:[%s618_s1 + $0x58] sm:$0xff] %v396_v29  ;;  %399 = vst [vmem:[%s618_s1 + $0x60] sm:$0xff] %v398_v30 }
  0x25   :  { %401 = vst [vmem:[%s618_s1 + $0x68] sm:$0xff] %v400_v31  ;;  %v402_v32 = vld [vmem:[#allocation1 + $0x70] sm:$0xff] }
  0x26   :  { %403 = vst [vmem:[%s618_s1 + $0x70] sm:$0xff] %v402_v32 }
  0x28   :  { %v404_v33 = vld [vmem:[#allocation1 + $0x78] sm:$0xff] }
  0x29   :  { %405 = vst [vmem:[%s618_s1 + $0x78] sm:$0xff] %v404_v33 }

// kernel: cls_forward.11
= control target key start
LH: loop header
LB: loop body
LE: loop exit
PB: predicated region body
PF: predicated region fallthrough
CT: control target
= control target key end

     0   :  { %s425_s12 = smov 0   ;;  %s427_s13 = smov 0   ;;  %s484_s0 = inlined_call_operand.vmem [shape: f32[4,512], index: 0, kind: input, shape index: {}]   ;;  %s485_s1 = inlined_call_operand.vmem [shape: bf16[16,4], index: 1, kind: input, shape index: {}]   ;;  %s486_s2 = inlined_call_operand.vmem [shape: f32[16,1], index: 2, kind: input, shape index: {}]   ;;  %s487_s3 = inlined_call_operand.vmem [shape: f32[16,512], index: 3, kind: output, shape index: {}]  }
   0x1   :  { %s429_s14 = smov 0  }
   0x2 LB: > { %s438_s15 = sadd.s32 4294967295, %s402_s14   ;;  %s440_s16 = sadd.s32 1, %s402_s14   ;;  %s402_s14 = sphi %s429_s14, %s491_s14   ;;  %s398_s13 = sphi %s427_s13, %s490_s13   ;;  %s394_s12 = sphi %s425_s12, %s489_s12  }
   0x3   : > { %s85_s17 = ssub.s32 %s402_s14, %s440_s16  ;;  %s88_s18 = sadd.s32 1, %s398_s13 }
   0x4   : > { %p86_p0 = scmp.eq.s32.totalorder %s85_s17, 0  ;;  %p98_p1 = scmp.ne.s32.totalorder %s398_s13, %s394_s12 }
   0x5   : > { %p99_p2 = scmp.eq.s32.totalorder %s438_s15, 1  ;;  %p339_p3 = scmp.ge.s32.totalorder %s402_s14, 1 }
   0x6   : > { %s448_s19 = scalar_select %p86_p0, %s398_s13, %s88_s18  }
   0x7   : > { %p450_p4 = por %p99_p2, %p98_p1  ;;  %p138_p5 = scmp.lt.s32.totalorder %s402_s14, 3 }
   0x9   : > { %p139_p6 = pnand %p339_p3, %p138_p5 }
   0xa   : > { %s341_s21 = sshll.u32 (!%p139_p6), %s438_s15, 1  ;;  %v404_v0 = vmov (!%p139_p6), 0   ;;  %v177_v1 = vld [vmem:[%s486_s2] sm:$0xff] (!%p139_p6)  ;;  %v178_v2 = vld [vmem:[%s486_s2 + $0x8] sm:$0xff] (!%p139_p6)  ;;  %vm198_vm0 = vcmask (!%p139_p6), 1041408   ;;  %vm194_vm1 = vcmask (!%p139_p6), 31744  }
   0xb   : > { %142 = sbr.rel (%p139_p6) target bundleno = 256 (0x100), region = 32  ;;  %p162_p7 = scmp.lt.s32.totalorder (!%p139_p6), %s341_s21, 3  ;;  %237 = vmatprep.mubr.bf16.mxu0 (!%p139_p6), %v404_v0  ;;  %377 = vset.pattern.permute.xlu0 (!%p139_p6), %v404_v0  ;;  %v379_v8 = vld [vmem:[%s485_s1] sm:$0xff] (!%p139_p6)  }
   0xc   : > { %181 = vperm.xlu0 (!%p139_p6), %377, %v177_v1   ;;  %s158_s5 = sand.u32 (!%p139_p6), 1, %s394_s12  }
   0xd   : > { %s340_s6 = sshll.u32 (!%p139_p6), %s158_s5, 5 }
   0xe   : > { %s160_s7 = scalar_lea.vmem (!%p139_p6), [#allocation2], %s340_s6 }
  0x10   : > { %186 = vperm.xlu0 (!%p139_p6), %377, %v178_v2  }
  0x12   : > { %s493_s21 = smov (!%p162_p7, %s341_s21), 3  ;;  %s351_s8 = sshll.u32 (%p450_p4), %s438_s15, 4 }
  0x13   : > { %s342_s26 = sshll.u32 %s493_s21, 2  ;;  %s261_s11 = scalar_lea.vmem (%p450_p4), %s487_s3, %s351_s8 }
  0x14   : > { %s165_s29 = scalar_lea.vmem %s484_s0, %s342_s26 }
  0x15   : > { %v169_v3 = vld [vmem:[%s165_s29] sm:$0xff] }
  0x16   : > { %v171_v4 = vcombine.high %v169_v3, %v169_v3  ;;  %v173_v5 = vpack.c.bf16 %v169_v3, %v169_v3 }
  0x18   : > { %v174_v6 = vpack.c.bf16 %v171_v4, %v171_v4  ;;  %v200_v7 = vsel %vm198_vm0, %v173_v5, 0 }
  0x1a   : > { %344 = vmatprep.subr.msk.bf16.mxu0 %vm198_vm0, %v174_v6 }
  0x1b   : > { %206 = vmatpush1.bf16.msra.mxu0 %v200_v7 }
  0x1e   : > { %345 = vmatmul.mubr.msk.bf16.vlgmr.msra.gmra.mrb[0].mxu0 %vm194_vm1, %v379_v8 }
  0x8b   : > { %v182_v9 = vpop.permute.xlu0 %181 }
  0x8f   : > { %v187_v13 = vpop.permute.xlu0 %186 }
  0xf1   : > { %v239_v10 = vpop.f32.mrb[0].mxu0  ;;  %258 = sbr.rel (!%p450_p4) target bundleno = 256 (0x100), region = 36 }
  0xf2   : > { %v240_v11 = vadd.f32 %v239_v10, %v182_v9  ;;  %v241_v12 = vpop.f32.mrb[1].mxu0 }
  0xf3   : > { %v242_v14 = vadd.f32 %v241_v12, %v182_v9  ;;  %v243_v15 = vpop.f32.mrb[2].mxu0 }
  0xf4   : > { %248 = vst [vmem:[%s160_s7] sm:$0xff] %v240_v11  ;;  %v244_v16 = vadd.f32 %v243_v15, %v187_v13  ;;  %v245_v17 = vpop.f32.mrb[3].mxu0 }
  0xf5   : > { %249 = vst [vmem:[%s160_s7 + $0x8] sm:$0xff] %v242_v14  ;;  %v246_v18 = vadd.f32 %v245_v17, %v187_v13 }
  0xf6   : > { %250 = vst [vmem:[%s160_s7 + $0x10] sm:$0xff] %v244_v16 }
  0xf7   : > { %251 = vst [vmem:[%s160_s7 + $0x18] sm:$0xff] %v246_v18 }
  0xfb   : > { %v274_v19 = vld [vmem:[%s160_s7] sm:$0xff] }
  0xfc   : > { %v276_v20 = vld [vmem:[%s160_s7 + $0x8] sm:$0xff]  ;;  %275 = vst [vmem:[%s261_s11] sm:$0xff] %v274_v19 }
  0xfd   : > { %v278_v21 = vld [vmem:[%s160_s7 + $0x10] sm:$0xff]  ;;  %277 = vst [vmem:[%s261_s11 + $0x8] sm:$0xff] %v276_v20 }
  0xfe   : > { %v280_v22 = vld [vmem:[%s160_s7 + $0x18] sm:$0xff]  ;;  %279 = vst [vmem:[%s261_s11 + $0x20] sm:$0xff] %v278_v21 }
  0xff   : > { %281 = vst [vmem:[%s261_s11 + $0x28] sm:$0xff] %v280_v22 }
 0x100 PF: > { %p10_p8 = scmp.ge.s32.totalorder %s440_s16, 4   ;;  %s489_s12 = smov %s398_s13 }
 0x101   : > { %s490_s13 = smov %s448_s19  ;;  %s491_s14 = smov %s440_s16 }
 0x102   :  { %12 = sbr.rel (!%p10_p8) target bundleno = 2 (0x2), region = 85 }

</bundles_post_ra>
